<compile_context>
chip_gen: v5e
topology: v5e:2x2
jax: 0.10.0
libtpu: 0.0.40
codegen_flags: <defaults>
</compile_context>

<pallas_src>
import jax
import jax.numpy as jnp
from jax import lax
from jax.experimental import pallas as pl
from jax.experimental.pallas import tpu as pltpu


def _round_up(x, m):
    return (x + m - 1) // m * m


# ------------------------------ Pallas kernel ------------------------------

def _encoder_fused_kernel(img_ref, w_conv_ref, b_conv_ref, w_fc_ref, b_fc_ref,
                          gamma_ref, beta_ref, out_ref, feat_acc):
    """Fused 3x3 conv + ReLU + GAP + fc + BatchNorm1d; one image per grid step.

    img_ref  : [1, H+2, W+2, Cin] f32  (zero-padded NHWC image of batch b)
    w_conv   : [9*Cin, CPAD]      bf16
    b_conv   : [1, CPAD]          f32
    w_fc     : [CPAD, EPAD]       f32
    b_fc/gamma/beta : [1, EPAD]   f32
    out      : [B, EPAD]          f32  (lane-dense, written once at the end)
    feat_acc : VMEM [B, CPAD]     f32  (per-batch GAP sums across grid steps)
    """
    b = pl.program_id(0)
    n_b = pl.num_programs(0)
    _, hp, wp, cin = img_ref.shape
    h, w = hp - 2, wp - 2
    hw = h * w

    @pl.when(b == 0)
    def _():
        feat_acc[...] = jnp.zeros_like(feat_acc)

    # Build the 3x3 'same'-conv patches in VMEM from 9 shifted slices of the
    # raw image tile (no 9x im2col expansion ever touches HBM).
    x = img_ref[0]                                               # [H+2, W+2, Cin]
    taps = [x[dy:dy + h, dx:dx + w, :]
            for dy in range(3) for dx in range(3)]               # 9 x [H, W, Cin]
    patches = jnp.concatenate(taps, axis=-1)                     # [H, W, 9*Cin]
    patches = patches.reshape(hw, 9 * cin).astype(jnp.bfloat16)  # [HW, 9*Cin]

    # Conv as a single bf16 MXU matmul with f32 accumulation; bias in f32.
    y = jnp.dot(patches, w_conv_ref[...],
                preferred_element_type=jnp.float32)              # [HW, CPAD]
    y = jnp.maximum(y + b_conv_ref[...], 0.0)                    # bias + ReLU

    # Global average pool as a bf16 MXU matmul (sum now, 1/HW once at the end).
    ones_row = jnp.ones((1, hw), jnp.bfloat16)
    gap = jnp.dot(ones_row, y.astype(jnp.bfloat16),
                  preferred_element_type=jnp.float32)            # [1, CPAD]

    # Scatter this image's feature sum into row b of the accumulator
    # (iota/compare select; no dynamic sublane store needed).
    rows = lax.broadcasted_iota(jnp.int32, feat_acc.shape, 0)
    feat_acc[...] += jnp.where(rows == b, gap, 0.0)

    @pl.when(b == n_b - 1)
    def _():
        feats = feat_acc[...] * (1.0 / hw)                       # finish the mean
        # fc (tiny -> kept f32 for accuracy) + BatchNorm1d training mode:
        # batch statistics, biased variance, eps = 1e-5.  The whole batch lives
        # in this single block, so the statistics are exact.
        z = jnp.dot(feats, w_fc_ref[...],
                    preferred_element_type=jnp.float32) + b_fc_ref[...]
        mu = jnp.mean(z, axis=0, keepdims=True)
        var = jnp.mean((z - mu) ** 2, axis=0, keepdims=True)
        inv = lax.rsqrt(var + 1e-5)
        out_ref[...] = gamma_ref[...] * (z - mu) * inv + beta_ref[...]


# ------------------------------- glue (JAX) --------------------------------

def encoder_cnn_forward(images, params):
    """images: [B, Cin, H, W] (NCHW) -> embeddings [B, embed_size]."""
    B, c_in, H, W = images.shape
    c_feat = params["w_conv"].shape[1]
    embed = params["w_fc"].shape[1]
    CPAD = _round_up(c_feat, 128)
    EPAD = _round_up(embed, 128)

    # Raw image, NHWC, zero 'same' padding.  This (not a 9x-expanded im2col
    # tensor, not a [B, B*HW] pooling matrix) is the only per-sample stream the
    # kernel reads from HBM.
    x = jnp.transpose(images, (0, 2, 3, 1)).astype(jnp.float32)
    x_pad = jnp.pad(x, ((0, 0), (1, 1), (1, 1), (0, 0)))         # [B, H+2, W+2, Cin]

    # Conv weight [3*3*Cin, Cfeat] -> lane-padded bf16 for the MXU; bias f32.
    w_conv = jnp.pad(params["w_conv"],
                     ((0, 0), (0, CPAD - c_feat))).astype(jnp.bfloat16)
    b_conv = jnp.pad(params["b_conv"][None, :], ((0, 0), (0, CPAD - c_feat)))

    # fc / bn params, lane-padded (padded lanes produce exactly-0 outputs and
    # are sliced off below).
    w_fc = jnp.pad(params["w_fc"], ((0, CPAD - c_feat), (0, EPAD - embed)))
    b_fc = jnp.pad(params["b_fc"][None, :], ((0, 0), (0, EPAD - embed)))
    gamma = jnp.pad(params["gamma"][None, :], ((0, 0), (0, EPAD - embed)))
    beta = jnp.pad(params["beta"][None, :], ((0, 0), (0, EPAD - embed)))

    grid_spec = pltpu.PrefetchScalarGridSpec(
        num_scalar_prefetch=0,
        grid=(B,),                    # one grid step per image; no partial tiles
        in_specs=[
            pl.BlockSpec((1, H + 2, W + 2, c_in), lambda b: (b, 0, 0, 0)),  # image
            pl.BlockSpec((9 * c_in, CPAD), lambda b: (0, 0)),               # w_conv
            pl.BlockSpec((1, CPAD), lambda b: (0, 0)),                      # b_conv
            pl.BlockSpec((CPAD, EPAD), lambda b: (0, 0)),                   # w_fc
            pl.BlockSpec((1, EPAD), lambda b: (0, 0)),                      # b_fc
            pl.BlockSpec((1, EPAD), lambda b: (0, 0)),                      # gamma
            pl.BlockSpec((1, EPAD), lambda b: (0, 0)),                      # beta
        ],
        out_specs=pl.BlockSpec((B, EPAD), lambda b: (0, 0)),
        scratch_shapes=[pltpu.VMEM((B, CPAD), jnp.float32)],
    )

    out_padded = pl.pallas_call(
        _encoder_fused_kernel,
        out_shape=jax.ShapeDtypeStruct((B, EPAD), jnp.float32),
        grid_spec=grid_spec,
        compiler_params=pltpu.CompilerParams(
            # The batch axis is a reduction: BatchNorm1d needs whole-batch
            # statistics and the output is written once -> "arbitrary".
            dimension_semantics=("arbitrary",),
            vmem_limit_bytes=32 * 1024 * 1024,
        ),
    )(x_pad, w_conv, b_conv, w_fc, b_fc, gamma, beta)

    return out_padded[:, :embed]


def init_params(key, c_in=3, c_feat=64, embed_size=32):
    """Deterministic synthetic parameters (shapes implied by the module)."""
    k1, k2, k3, k4 = jax.random.split(key, 4)
    kdim = 3 * 3 * c_in
    return {
        # stand-in backbone conv: weight laid out [kh*kw*Cin, Cfeat]
        "w_conv": 0.1 * jax.random.normal(k1, (kdim, c_feat), jnp.float32),
        "b_conv": 0.1 * jax.random.normal(k2, (c_feat,), jnp.float32),
        # self.fc = nn.Linear(in_features, embed_size)
        "w_fc": 0.1 * jax.random.normal(k3, (c_feat, embed_size), jnp.float32),
        "b_fc": 0.1 * jax.random.normal(k4, (embed_size,), jnp.float32),
        # self.bn = nn.BatchNorm1d(embed_size): default weight=1, bias=0
        "gamma": jnp.ones((embed_size,), jnp.float32),
        "beta": jnp.zeros((embed_size,), jnp.float32),
    }


if __name__ == "__main__":
    key = jax.random.PRNGKey(0)
    k_img, k_par = jax.random.split(key)

    B, C_IN, H, W = 4, 3, 16, 16        # small NCHW image batch
    C_FEAT, EMBED = 64, 32              # backbone feature dim, embed_size

    images = jax.random.normal(k_img, (B, C_IN, H, W), jnp.float32)
    params = init_params(k_par, c_in=C_IN, c_feat=C_FEAT, embed_size=EMBED)

    out = encoder_cnn_forward(images, params)
    out = jax.block_until_ready(out)

    assert out.shape == (B, EMBED) and out.dtype == jnp.float32
    assert bool(jnp.all(jnp.isfinite(out)))
    print("KERNEL_OK")
</pallas_src>

<mosaic_0001>
module attributes {stable_mosaic.version = 11 : i64} {
  func.func @_encoder_fused_kernel(%arg0: i32, %arg1: memref<1x18x18x3xf32, #tpu.memory_space<vmem>>, %arg2: memref<27x128xbf16, #tpu.memory_space<vmem>>, %arg3: memref<1x128xf32, #tpu.memory_space<vmem>>, %arg4: memref<128x128xf32, #tpu.memory_space<vmem>>, %arg5: memref<1x128xf32, #tpu.memory_space<vmem>>, %arg6: memref<1x128xf32, #tpu.memory_space<vmem>>, %arg7: memref<1x128xf32, #tpu.memory_space<vmem>>, %arg8: memref<4x128xf32, #tpu.memory_space<vmem>>, %arg9: memref<4x128xf32, #tpu.memory_space<vmem>>) attributes {dimension_semantics = [#tpu.dimension_semantics<arbitrary>], iteration_bounds = array<i64: 4>, scalar_prefetch = 0 : i64, scratch_operands = 1 : i64, tpu.core_type = #tpu.core_type<tc>, window_params = [{transform_indices = @transform_0, window_bounds = array<i64: 1, 18, 18, 3>}, {pipeline_mode = #tpu.pipeline_mode<synchronous>, transform_indices = @transform_1, window_bounds = array<i64: 27, 128>}, {pipeline_mode = #tpu.pipeline_mode<synchronous>, transform_indices = @transform_2, window_bounds = array<i64: 1, 128>}, {pipeline_mode = #tpu.pipeline_mode<synchronous>, transform_indices = @transform_3, window_bounds = array<i64: 128, 128>}, {pipeline_mode = #tpu.pipeline_mode<synchronous>, transform_indices = @transform_4, window_bounds = array<i64: 1, 128>}, {pipeline_mode = #tpu.pipeline_mode<synchronous>, transform_indices = @transform_5, window_bounds = array<i64: 1, 128>}, {pipeline_mode = #tpu.pipeline_mode<synchronous>, transform_indices = @transform_6, window_bounds = array<i64: 1, 128>}, {pipeline_mode = #tpu.pipeline_mode<synchronous>, transform_indices = @transform_7, window_bounds = array<i64: 4, 128>}]} {
    %c0_i32 = arith.constant 0 : i32
    %0 = arith.cmpi eq, %arg0, %c0_i32 : i32
    %1 = arith.extui %0 : i1 to i32
    %c0_i32_0 = arith.constant 0 : i32
    %2 = arith.cmpi ne, %1, %c0_i32_0 : i32
    scf.if %2 {
      %cst_17 = arith.constant 0.000000e+00 : f32
      %40 = vector.broadcast %cst_17 : f32 to vector<4x128xf32>
      %c0_18 = arith.constant 0 : index
      %c0_19 = arith.constant 0 : index
      %41 = vector.load %arg9[%c0_18, %c0_19] : memref<4x128xf32, #tpu.memory_space<vmem>>, vector<4x128xf32>
      tpu.vector_store %arg9[%c0_18, %c0_19], %40 {strides = array<i32>} : memref<4x128xf32, #tpu.memory_space<vmem>>, vector<4x128xf32>,
    } else {
    }
    %c0 = arith.constant 0 : index
    %c0_1 = arith.constant 0 : index
    %c0_2 = arith.constant 0 : index
    %c0_3 = arith.constant 0 : index
    %3 = vector.load %arg1[%c0, %c0_1, %c0_2, %c0_3] : memref<1x18x18x3xf32, #tpu.memory_space<vmem>>, vector<1x18x18x3xf32>
    %4 = vector.shape_cast %3 : vector<1x18x18x3xf32> to vector<18x18x3xf32>
    %5 = vector.extract_strided_slice %4 {offsets = [0, 0, 0], sizes = [16, 16, 3], strides = [1, 1, 1]} : vector<18x18x3xf32> to vector<16x16x3xf32>
    %6 = vector.extract_strided_slice %4 {offsets = [0, 1, 0], sizes = [16, 16, 3], strides = [1, 1, 1]} : vector<18x18x3xf32> to vector<16x16x3xf32>
    %7 = vector.extract_strided_slice %4 {offsets = [0, 2, 0], sizes = [16, 16, 3], strides = [1, 1, 1]} : vector<18x18x3xf32> to vector<16x16x3xf32>
    %8 = vector.extract_strided_slice %4 {offsets = [1, 0, 0], sizes = [16, 16, 3], strides = [1, 1, 1]} : vector<18x18x3xf32> to vector<16x16x3xf32>
    %9 = vector.extract_strided_slice %4 {offsets = [1, 1, 0], sizes = [16, 16, 3], strides = [1, 1, 1]} : vector<18x18x3xf32> to vector<16x16x3xf32>
    %10 = vector.extract_strided_slice %4 {offsets = [1, 2, 0], sizes = [16, 16, 3], strides = [1, 1, 1]} : vector<18x18x3xf32> to vector<16x16x3xf32>
    %11 = vector.extract_strided_slice %4 {offsets = [2, 0, 0], sizes = [16, 16, 3], strides = [1, 1, 1]} : vector<18x18x3xf32> to vector<16x16x3xf32>
    %12 = vector.extract_strided_slice %4 {offsets = [2, 1, 0], sizes = [16, 16, 3], strides = [1, 1, 1]} : vector<18x18x3xf32> to vector<16x16x3xf32>
    %13 = vector.extract_strided_slice %4 {offsets = [2, 2, 0], sizes = [16, 16, 3], strides = [1, 1, 1]} : vector<18x18x3xf32> to vector<16x16x3xf32>
    %14 = tpu.concatenate %5, %6, %7, %8, %9, %10, %11, %12, %13 in 2 : vector<16x16x3xf32>, vector<16x16x3xf32>, vector<16x16x3xf32>, vector<16x16x3xf32>, vector<16x16x3xf32>, vector<16x16x3xf32>, vector<16x16x3xf32>, vector<16x16x3xf32>, vector<16x16x3xf32> -> vector<16x16x27xf32>
    %15 = vector.shape_cast %14 : vector<16x16x27xf32> to vector<256x27xf32>
    %16 = arith.truncf %15 : vector<256x27xf32> to vector<256x27xbf16>
    %c0_4 = arith.constant 0 : index
    %c0_5 = arith.constant 0 : index
    %17 = vector.load %arg2[%c0_4, %c0_5] : memref<27x128xbf16, #tpu.memory_space<vmem>>, vector<27x128xbf16>
    %cst = arith.constant dense<0.000000e+00> : vector<256x128xf32>
    %18 = tpu.matmul %16, %17, %cst {dimension_numbers = #tpu.dot_dimension_numbers<[1], [0], [0], [1], [0, 0, 1, 1], [], []>} : vector<256x27xbf16>, vector<27x128xbf16>, vector<256x128xf32> -> vector<256x128xf32>
    %c0_6 = arith.constant 0 : index
    %c0_7 = arith.constant 0 : index
    %19 = vector.load %arg3[%c0_6, %c0_7] : memref<1x128xf32, #tpu.memory_space<vmem>>, vector<1x128xf32>
    %20 = vector.broadcast %19 : vector<1x128xf32> to vector<256x128xf32>
    %21 = arith.addf %18, %20 : vector<256x128xf32>
    %cst_8 = arith.constant 0.000000e+00 : f32
    %22 = vector.broadcast %cst_8 : f32 to vector<256x128xf32>
    %23 = arith.maximumf %21, %22 : vector<256x128xf32>
    %cst_9 = arith.constant 1.000000e+00 : bf16
    %24 = vector.broadcast %cst_9 : bf16 to vector<1x256xbf16>
    %25 = arith.truncf %23 : vector<256x128xf32> to vector<256x128xbf16>
    %cst_10 = arith.constant dense<0.000000e+00> : vector<1x128xf32>
    %26 = tpu.matmul %24, %25, %cst_10 {dimension_numbers = #tpu.dot_dimension_numbers<[1], [0], [0], [1], [0, 0, 1, 1], [], []>} : vector<1x256xbf16>, vector<256x128xbf16>, vector<1x128xf32> -> vector<1x128xf32>
    %27 = tpu.iota {dimensions = array<i32: 0>} : vector<4x128xi32>
    %c0_11 = arith.constant 0 : index
    %c0_12 = arith.constant 0 : index
    %28 = vector.load %arg9[%c0_11, %c0_12] : memref<4x128xf32, #tpu.memory_space<vmem>>, vector<4x128xf32>
    %29 = vector.broadcast %arg0 : i32 to vector<4x128xi32>
    %30 = arith.cmpi eq, %27, %29 : vector<4x128xi32>
    %cst_13 = arith.constant 0.000000e+00 : f32
    %31 = vector.shape_cast %26 : vector<1x128xf32> to vector<1x128xf32>
    %32 = vector.broadcast %31 : vector<1x128xf32> to vector<4x128xf32>
    %33 = vector.broadcast %cst_13 : f32 to vector<4x128xf32>
    %34 = arith.select %30, %32, %33 : vector<4x128xi1>, vector<4x128xf32>
    %35 = arith.addf %28, %34 : vector<4x128xf32>
    %c0_14 = arith.constant 0 : index
    %c0_15 = arith.constant 0 : index
    %36 = vector.load %arg9[%c0_14, %c0_15] : memref<4x128xf32, #tpu.memory_space<vmem>>, vector<4x128xf32>
    tpu.vector_store %arg9[%c0_14, %c0_15], %35 {strides = array<i32>} : memref<4x128xf32, #tpu.memory_space<vmem>>, vector<4x128xf32>,
    %c3_i32 = arith.constant 3 : i32
    %37 = arith.cmpi eq, %arg0, %c3_i32 : i32
    %38 = arith.extui %37 : i1 to i32
    %c0_i32_16 = arith.constant 0 : i32
    %39 = arith.cmpi ne, %38, %c0_i32_16 : i32
    scf.if %39 {
      %c0_17 = arith.constant 0 : index
      %c0_18 = arith.constant 0 : index
      %40 = vector.load %arg9[%c0_17, %c0_18] : memref<4x128xf32, #tpu.memory_space<vmem>>, vector<4x128xf32>
      %cst_19 = arith.constant 3.906250e-03 : f32
      %41 = vector.broadcast %cst_19 : f32 to vector<4x128xf32>
      %42 = arith.mulf %40, %41 : vector<4x128xf32>
      %c0_20 = arith.constant 0 : index
      %c0_21 = arith.constant 0 : index
      %43 = vector.load %arg4[%c0_20, %c0_21] : memref<128x128xf32, #tpu.memory_space<vmem>>, vector<128x128xf32>
      %cst_22 = arith.constant dense<0.000000e+00> : vector<4x128xf32>
      %44 = tpu.matmul %42, %43, %cst_22 {dimension_numbers = #tpu.dot_dimension_numbers<[1], [0], [0], [1], [0, 0, 1, 1], [], []>} : vector<4x128xf32>, vector<128x128xf32>, vector<4x128xf32> -> vector<4x128xf32>
      %c0_23 = arith.constant 0 : index
      %c0_24 = arith.constant 0 : index
      %45 = vector.load %arg5[%c0_23, %c0_24] : memref<1x128xf32, #tpu.memory_space<vmem>>, vector<1x128xf32>
      %46 = vector.broadcast %45 : vector<1x128xf32> to vector<4x128xf32>
      %47 = arith.addf %44, %46 : vector<4x128xf32>
      %cst_25 = arith.constant dense<0.000000e+00> : vector<128xf32>
      %48 = vector.multi_reduction <add>, %47, %cst_25 [0] : vector<4x128xf32> to vector<128xf32>
      %49 = vector.shape_cast %48 : vector<128xf32> to vector<1x128xf32>
      %cst_26 = arith.constant 4.000000e+00 : f32
      %50 = vector.broadcast %cst_26 : f32 to vector<1x128xf32>
      %51 = arith.divf %49, %50 : vector<1x128xf32>
      %52 = vector.broadcast %51 : vector<1x128xf32> to vector<4x128xf32>
      %53 = arith.subf %47, %52 : vector<4x128xf32>
      %54 = arith.mulf %53, %53 : vector<4x128xf32>
      %cst_27 = arith.constant dense<0.000000e+00> : vector<128xf32>
      %55 = vector.multi_reduction <add>, %54, %cst_27 [0] : vector<4x128xf32> to vector<128xf32>
      %56 = vector.shape_cast %55 : vector<128xf32> to vector<1x128xf32>
      %cst_28 = arith.constant 4.000000e+00 : f32
      %57 = vector.broadcast %cst_28 : f32 to vector<1x128xf32>
      %58 = arith.divf %56, %57 : vector<1x128xf32>
      %cst_29 = arith.constant 9.99999974E-6 : f32
      %59 = vector.broadcast %cst_29 : f32 to vector<1x128xf32>
      %60 = arith.addf %58, %59 : vector<1x128xf32>
      %61 = math.rsqrt %60 : vector<1x128xf32>
      %c0_30 = arith.constant 0 : index
      %c0_31 = arith.constant 0 : index
      %62 = vector.load %arg6[%c0_30, %c0_31] : memref<1x128xf32, #tpu.memory_space<vmem>>, vector<1x128xf32>
      %63 = vector.broadcast %51 : vector<1x128xf32> to vector<4x128xf32>
      %64 = arith.subf %47, %63 : vector<4x128xf32>
      %65 = vector.broadcast %62 : vector<1x128xf32> to vector<4x128xf32>
      %66 = arith.mulf %65, %64 : vector<4x128xf32>
      %67 = vector.broadcast %61 : vector<1x128xf32> to vector<4x128xf32>
      %68 = arith.mulf %66, %67 : vector<4x128xf32>
      %c0_32 = arith.constant 0 : index
      %c0_33 = arith.constant 0 : index
      %69 = vector.load %arg7[%c0_32, %c0_33] : memref<1x128xf32, #tpu.memory_space<vmem>>, vector<1x128xf32>
      %70 = vector.broadcast %69 : vector<1x128xf32> to vector<4x128xf32>
      %71 = arith.addf %68, %70 : vector<4x128xf32>
      %c0_34 = arith.constant 0 : index
      %c0_35 = arith.constant 0 : index
      %72 = vector.load %arg8[%c0_34, %c0_35] : memref<4x128xf32, #tpu.memory_space<vmem>>, vector<4x128xf32>
      tpu.vector_store %arg8[%c0_34, %c0_35], %71 {strides = array<i32>} : memref<4x128xf32, #tpu.memory_space<vmem>>, vector<4x128xf32>,
    } else {
    }
    return
  }
  func.func @transform_0(%arg0: i32) -> (i32, i32, i32, i32) {
    %c0_i32 = arith.constant 0 : i32
    %c0_i32_0 = arith.constant 0 : i32
    %c0_i32_1 = arith.constant 0 : i32
    %c0_i32_2 = arith.constant 0 : i32
    return %arg0, %c0_i32, %c0_i32_0, %c0_i32_1 : i32, i32, i32, i32
  }
  func.func @transform_1(%arg0: i32) -> (i32, i32) {
    %c0_i32 = arith.constant 0 : i32
    %c0_i32_0 = arith.constant 0 : i32
    %c0_i32_1 = arith.constant 0 : i32
    return %c0_i32, %c0_i32_0 : i32, i32
  }
  func.func @transform_2(%arg0: i32) -> (i32, i32) {
    %c0_i32 = arith.constant 0 : i32
    %c0_i32_0 = arith.constant 0 : i32
    %c0_i32_1 = arith.constant 0 : i32
    return %c0_i32, %c0_i32_0 : i32, i32
  }
  func.func @transform_3(%arg0: i32) -> (i32, i32) {
    %c0_i32 = arith.constant 0 : i32
    %c0_i32_0 = arith.constant 0 : i32
    %c0_i32_1 = arith.constant 0 : i32
    return %c0_i32, %c0_i32_0 : i32, i32
  }
  func.func @transform_4(%arg0: i32) -> (i32, i32) {
    %c0_i32 = arith.constant 0 : i32
    %c0_i32_0 = arith.constant 0 : i32
    %c0_i32_1 = arith.constant 0 : i32
    return %c0_i32, %c0_i32_0 : i32, i32
  }
  func.func @transform_5(%arg0: i32) -> (i32, i32) {
    %c0_i32 = arith.constant 0 : i32
    %c0_i32_0 = arith.constant 0 : i32
    %c0_i32_1 = arith.constant 0 : i32
    return %c0_i32, %c0_i32_0 : i32, i32
  }
  func.func @transform_6(%arg0: i32) -> (i32, i32) {
    %c0_i32 = arith.constant 0 : i32
    %c0_i32_0 = arith.constant 0 : i32
    %c0_i32_1 = arith.constant 0 : i32
    return %c0_i32, %c0_i32_0 : i32, i32
  }
  func.func @transform_7(%arg0: i32) -> (i32, i32) {
    %c0_i32 = arith.constant 0 : i32
    %c0_i32_0 = arith.constant 0 : i32
    %c0_i32_1 = arith.constant 0 : i32
    return %c0_i32, %c0_i32_0 : i32, i32
  }
}

</mosaic_0001>

<bundles_post_ra>
// kernel: tpu_custom_call.1
= control target key start
LH: loop header
LB: loop body
LE: loop exit
PB: predicated region body
PF: predicated region fallthrough
CT: control target
= control target key end

     0   :  { %12 = vsyncpa [#allocation4], 0  ;;  %s2825_s24 = smov 0   ;;  %s4240_s0 = inlined_call_operand.vmem [shape: f32[4,18,18,3], index: 0, kind: input, shape index: {}]   ;;  %s4241_s1 = inlined_call_operand.vmem [shape: bf16[27,128], index: 1, kind: input, shape index: {}]   ;;  %s4242_s2 = inlined_call_operand.vmem [shape: f32[1,128], index: 2, kind: input, shape index: {}]   ;;  %s4243_s3 = inlined_call_operand.vmem [shape: f32[128,128], index: 3, kind: input, shape index: {}]   ;;  %s4244_s4 = inlined_call_operand.vmem [shape: f32[1,128], index: 4, kind: input, shape index: {}]   ;;  %s4245_s5 = inlined_call_operand.vmem [shape: f32[1,128], index: 5, kind: input, shape index: {}]   ;;  %s4246_s6 = inlined_call_operand.vmem [shape: f32[1,128], index: 6, kind: input, shape index: {}]   ;;  %s4247_s7 = inlined_call_operand.hbm [shape: f32[4,128], index: 7, kind: output, shape index: {}]  }
   0x1 LB: > { %s2831_s25 = sadd.s32 4294967295, %s2770_s24   ;;  %p2002_p0 = scmp.ge.s32.totalorder %s2770_s24, 1  ;;  %s2770_s24 = sphi %s2825_s24, %s18_s24  }
   0x2   : > { %p233_p1 = scmp.lt.s32.totalorder %s2770_s24, 5 }
   0x4   : > { %p234_p2 = pnand %p2002_p0, %p233_p1 }
   0x6   : > { %237 = sbr.rel (%p234_p2) target bundleno = 1002 (0x3ea), region = 48 }
   0xb   : > { %p260_p3 = scmp.lt.s32.totalorder %s2831_s25, 3  ;;  %p2004_p4 = scmp.ne.s32.totalorder %s2831_s25, 0 }
   0xd   : > { %s261_s26 = scalar_select %p260_p3, %s2831_s25, 3 }
   0xe   : > { %270 = sbr.rel (%p2004_p4) target bundleno = 21 (0x15), region = 52 }
   0xf   : > { %s2040_s27 = smul.u32 432, %s261_s26 }
  0x11   : > { %s2840_s30 = scalar_lea.vmem %s4240_s0, %s2040_s27 }
  0x13   : > { %v2772_v0 = vmov 0.0  }
  0x14   : > { %271 = vst [vmem:[#allocation2] sm:$0xf] %v2772_v0 }
  0x15 PF: > { %v2844_v1 = vld [vmem:[%s2840_s30 + $0x60] sm:$0xff]  ;;  %v2847_v2 = vld [vmem:[%s2840_s30 + $0x68] sm:$0xff]  ;;  %v2850_v3 = vld [vmem:[%s2840_s30 + $0x70] sm:$0x3]  ;;  %vm374_vm0 = vcmask 1046528   ;;  %s2773_s8 = smov 3  }
  0x16   : > { %v395_v4 = vrot.slane %v2844_v1, 1  ;;  %v396_v5 = vrot.slane %v2847_v2, 1  ;;  %v398_v6 = vrot.slane %v2850_v3, 1  ;;  %v2856_v7 = vld [vmem:[%s2840_s30 + $0x30] sm:$0xff]  ;;  %v2859_v8 = vld [vmem:[%s2840_s30 + $0x38] sm:$0xff]  ;;  %v2867_v12 = vld [vmem:[%s2840_s30] sm:$0xff] }
  0x17   : > { %v2862_v9 = vld [vmem:[%s2840_s30 + $0x40] sm:$0x3]  ;;  %v385_v10 = vrot.slane %v2856_v7, 1  ;;  %v386_v11 = vrot.slane %v2859_v8, 1  ;;  %4302 = vst [vmem:[#allocation6_spill] sm:$0xff] %v2867_v12  ;;  %v2870_v13 = vld [vmem:[%s2840_s30 + $0x8] sm:$0xff] }
  0x18   : > { %v397_v14 = vsel %vm374_vm0, %v395_v4, %v396_v5  ;;  %v399_v15 = vsel %vm374_vm0, %v396_v5, %v398_v6  ;;  %v388_v16 = vrot.slane %v2862_v9, 1  ;;  %v2876_v17 = vld [vmem:[%s2840_s30 + $0x10] sm:$0x3]  ;;  %v2879_v18 = vld [vmem:[%s2840_s30 + $0x78] sm:$0xff]  ;;  %v2882_v19 = vld [vmem:[%s2840_s30 + $0x80] sm:$0xff]  ;;  %v375_v22 = vrot.slane %v2867_v12, 1 }
  0x19   : > { %v2884_v20 = vpack.i.bf16 %v399_v15, %v397_v14  ;;  %v387_v21 = vsel %vm374_vm0, %v385_v10, %v386_v11  ;;  %v376_v23 = vrot.slane %v2870_v13, 1  ;;  %v2890_v24 = vld [vmem:[%s2840_s30 + $0x88] sm:$0x3]  ;;  %v2896_v26 = vld [vmem:[%s2840_s30 + $0x50] sm:$0xff]  ;;  %v378_v28 = vrot.slane %v2876_v17, 1  ;;  %v2905_v31 = vld [vmem:[%s2840_s30 + $0x18] sm:$0xff] }
  0x1a   : > { %v2893_v25 = vld [vmem:[%s2840_s30 + $0x48] sm:$0xff]  ;;  %v389_v27 = vsel %vm374_vm0, %v386_v11, %v388_v16  ;;  %v400_v29 = vrot.slane %v2879_v18, 1  ;;  %v2902_v30 = vld [vmem:[%s2840_s30 + $0x58] sm:$0x3]  ;;  %v401_v34 = vrot.slane %v2882_v19, 1  ;;  %v403_v35 = vrot.slane %v2890_v24, 1 }
  0x1b   : > { %4303 = vst [vmem:[#allocation7_spill] sm:$0xff] %v2884_v20  ;;  %2089 = vrot.lane.b32.xlu2 %v2884_v20, %s2773_s8  ;;  %v2909_v32 = vpack.i.bf16 %v389_v27, %v387_v21  ;;  %v377_v33 = vsel %vm374_vm0, %v375_v22, %v376_v23  ;;  %v2915_v36 = vld [vmem:[%s2840_s30 + $0x20] sm:$0xff]  ;;  %v2918_v37 = vld [vmem:[%s2840_s30 + $0x28] sm:$0x3]  ;;  %v379_v38 = vsel %vm374_vm0, %v376_v23, %v378_v28  ;;  %v390_v39 = vrot.slane %v2893_v25, 1  ;;  %v2951_v57 = vld [vmem:[%s2840_s30 + $0xb0] sm:$0xff] }
  0x1c   : > { %v391_v40 = vrot.slane %v2896_v26, 1  ;;  %v393_v41 = vrot.slane %v2902_v30, 1  ;;  %v2925_v42 = vld [vmem:[%s2840_s30 + $0xc0] sm:$0xff]  ;;  %v2928_v43 = vld [vmem:[%s2840_s30 + $0xc8] sm:$0xff]  ;;  %v2068_v44 = vpack.i.bf16 %v379_v38, %v377_v33  ;;  %v402_v45 = vsel %vm374_vm0, %v400_v29, %v401_v34  ;;  %v2936_v48 = vld [vmem:[%s2840_s30 + $0xd0] sm:$0x3] }
  0x1d   : > { %4304 = vst [vmem:[#allocation8_spill] sm:$0xff] %v2909_v32  ;;  %2079 = vrot.lane.b32.xlu1 %v2909_v32, %s2773_s8  ;;  %v404_v46 = vsel %vm374_vm0, %v401_v34, %v403_v35  ;;  %v380_v47 = vrot.slane %v2905_v31, 1  ;;  %v381_v51 = vrot.slane %v2915_v36, 1  ;;  %v2942_v52 = vld [vmem:[%s2840_s30 + $0xa8] sm:$0xff]  ;;  %v383_v54 = vrot.slane %v2918_v37, 1  ;;  %v2962_v63 = vld [vmem:[%s2840_s30 + $0x90] sm:$0xff] }
  0x1e   : > { %v392_v49 = vsel %vm374_vm0, %v390_v39, %v391_v40  ;;  %v394_v50 = vsel %vm374_vm0, %v391_v40, %v393_v41  ;;  %2069 = vrot.lane.b32.xlu0 %v2068_v44, %s2773_s8  ;;  %v2945_v53 = vpack.i.bf16 %v404_v46, %v402_v45  ;;  %v415_v55 = vrot.slane %v2925_v42, 1  ;;  %v2954_v58 = vld [vmem:[%s2840_s30 + $0xb8] sm:$0x3]  ;;  %v2968_v4 = vld [vmem:[%s2840_s30 + $0xa0] sm:$0x3]  ;;  %v2983_v23 = vld [vmem:[%s2840_s30 + $0x108] sm:$0xff] }
  0x1f   : > { %v416_v56 = vrot.slane %v2928_v43, 1  ;;  %v382_v59 = vsel %vm374_vm0, %v380_v47, %v381_v51  ;;  %v418_v60 = vrot.slane %v2936_v48, 1  ;;  %v2958_v61 = vpack.i.bf16 %v394_v50, %v392_v49  ;;  %v2965_v0 = vld [vmem:[%s2840_s30 + $0x98] sm:$0xff]  ;;  %v2986_v27 = vld [vmem:[%s2840_s30 + $0x110] sm:$0xff]  ;;  %v3008_v41 = vld [vmem:[%s2840_s30 + $0x100] sm:$0x3] }
  0x20   : > { %4305 = vst [vmem:[#allocation9_spill] sm:$0xff] %v2945_v53  ;;  %v384_v62 = vsel %vm374_vm0, %v381_v51, %v383_v54  ;;  %v410_v5 = vrot.slane %v2942_v52, 1  ;;  %v411_v6 = vrot.slane %v2951_v57, 1  ;;  %v413_v10 = vrot.slane %v2954_v58, 1  ;;  %v2991_v28 = vld [vmem:[%s2840_s30 + $0x118] sm:$0x3] }
  0x21   : > { %v2975_v11 = vpack.i.bf16 %v384_v62, %v382_v59  ;;  %v417_v14 = vsel %vm374_vm0, %v415_v55, %v416_v56  ;;  %v419_v15 = vsel %vm374_vm0, %v416_v56, %v418_v60  ;;  %v405_v16 = vrot.slane %v2962_v63, 1  ;;  %v3002_v39 = vld [vmem:[%s2840_s30 + $0xf0] sm:$0xff]  ;;  %v3005_v40 = vld [vmem:[%s2840_s30 + $0xf8] sm:$0xff]  ;;  %v3019_v50 = vld [vmem:[%s2840_s30 + $0xe0] sm:$0xff]  ;;  %s2774_s9 = smov 6   ;;  %s2775_s10 = smov 9  }
  0x22   : > { %v406_v21 = vrot.slane %v2965_v0, 1  ;;  %v408_v22 = vrot.slane %v2968_v4, 1  ;;  %v412_v29 = vsel %vm374_vm0, %v410_v5, %v411_v6  ;;  %v414_v33 = vsel %vm374_vm0, %v411_v6, %v413_v10  ;;  %v3016_v49 = vld [vmem:[%s2840_s30 + $0xd8] sm:$0xff]  ;;  %v3022_v51 = vld [vmem:[%s2840_s30 + $0xe8] sm:$0x3]  ;;  %s2776_s11 = smov 12  }
  0x23   : > { %2094 = vrot.lane.b32.xlu2 %v2945_v53, %s2773_s8  ;;  %4306 = vst [vmem:[#allocation10_spill] sm:$0xff] %v2975_v11  ;;  %v2997_v34 = vpack.i.bf16 %v419_v15, %v417_v14  ;;  %v430_v35 = vrot.slane %v2983_v23, 1  ;;  %v431_v38 = vrot.slane %v2986_v27, 1  ;;  %v433_v46 = vrot.slane %v2991_v28, 1  ;;  %v3037_v14 = vld [vmem:[%s2840_s30 + $0x150] sm:$0xff]  ;;  %v3040_v15 = vld [vmem:[%s2840_s30 + $0x158] sm:$0xff] }
  0x24   : > { %v407_v44 = vsel %vm374_vm0, %v405_v16, %v406_v21  ;;  %v409_v45 = vsel %vm374_vm0, %v406_v21, %v408_v22  ;;  %v3013_v47 = vpack.i.bf16 %v414_v33, %v412_v29  ;;  %v425_v54 = vrot.slane %v3002_v39, 1  ;;  %4310 = vst [vmem:[#allocation14_spill] sm:$0xff] %v3037_v14  ;;  %v3045_v16 = vld [vmem:[%s2840_s30 + $0x160] sm:$0x3]  ;;  %s2777_s12 = smov 18   ;;  %s2778_s13 = smov 15  }
  0x25   : > { %2084 = vrot.lane.b32.xlu1 %v2958_v61, %s2773_s8  ;;  %4307 = vst [vmem:[#allocation11_spill] sm:$0xff] %v2997_v34  ;;  %v426_v55 = vrot.slane %v3005_v40, 1  ;;  %v428_v56 = vrot.slane %v3008_v41, 1  ;;  %v3029_v59 = vpack.i.bf16 %v409_v45, %v407_v44  ;;  %v432_v60 = vsel %vm374_vm0, %v430_v35, %v431_v38  ;;  %v3059_v44 = vld [vmem:[%s2840_s30 + $0x140] sm:$0xff]  ;;  %v3062_v45 = vld [vmem:[%s2840_s30 + $0x148] sm:$0x3] }
  0x26   : > { %2074 = vrot.lane.b32.xlu0 %v2975_v11, %s2773_s8  ;;  %4308 = vst [vmem:[#allocation12_spill] sm:$0xff] %v3013_v47  ;;  %v434_v62 = vsel %vm374_vm0, %v431_v38, %v433_v46  ;;  %v420_v5 = vrot.slane %v3016_v49, 1  ;;  %v421_v6 = vrot.slane %v3019_v50, 1  ;;  %v423_v10 = vrot.slane %v3022_v51, 1  ;;  %v3056_v38 = vld [vmem:[%s2840_s30 + $0x138] sm:$0xff]  ;;  %s2779_s14 = smov 24  }
  0x27   : > { %4309 = vst [vmem:[#allocation13_spill] sm:$0xff] %v3029_v59  ;;  %v427_v21 = vsel %vm374_vm0, %v425_v54, %v426_v55  ;;  %v429_v22 = vsel %vm374_vm0, %v426_v55, %v428_v56  ;;  %v3051_v29 = vpack.i.bf16 %v434_v62, %v432_v60  ;;  %v445_v33 = vrot.slane %v3037_v14, 1  ;;  %v3070_v60 = vld [vmem:[%s2840_s30 + $0x120] sm:$0xff]  ;;  %v3073_v62 = vld [vmem:[%s2840_s30 + $0x128] sm:$0xff]  ;;  %s2780_s15 = smov 21   ;;  %p2029_p5 = scmp.ne.s32.totalorder %s2831_s25, 3 }
  0x28   : > { %v446_v35 = vrot.slane %v3040_v15, 1  ;;  %v422_v46 = vsel %vm374_vm0, %v420_v5, %v421_v6  ;;  %v424_v54 = vsel %vm374_vm0, %v421_v6, %v423_v10  ;;  %v448_v55 = vrot.slane %v3045_v16, 1 }
  0x29   : > { %4311 = vst [vmem:[#allocation15_spill] sm:$0xff] %v3051_v29  ;;  %v3067_v56 = vpack.i.bf16 %v429_v22, %v427_v21  ;;  %v441_v20 = vrot.slane %v3059_v44, 1  ;;  %v443_v53 = vrot.slane %v3062_v45, 1  ;;  %v3083_v5 = vpack.i.bf16 %v424_v54, %v422_v46 }
  0x2a   : > { %v447_v6 = vsel %vm374_vm0, %v445_v33, %v446_v35  ;;  %v449_v10 = vsel %vm374_vm0, %v446_v35, %v448_v55  ;;  %v435_v21 = vrot.slane %v3070_v60, 1  ;;  %v436_v22 = vrot.slane %v3073_v62, 1 }
  0x2b   : > { %2109 = vrot.lane.b32.xlu2 %v2997_v34, %s2773_s8  ;;  %4312 = vst [vmem:[#allocation16_spill] sm:$0xff] %v3067_v56  ;;  %v440_v34 = vrot.slane %v3056_v38, 1  ;;  %v444_v46 = vsel %vm374_vm0, %v441_v20, %v443_v53  ;;  %v3096_v33 = vpack.i.bf16 %v449_v10, %v447_v6  ;;  %v557_v35 = vrot.slane %v2905_v31, 2  ;;  %v3112_v53 = vld [vmem:[%s2840_s30 + $0x178] sm:$0x3] }
  0x2c   : > { %4313 = vst [vmem:[#allocation17_spill] sm:$0xff] %v3083_v5  ;;  %v558_v54 = vrot.slane %v2915_v36, 2  ;;  %v437_v55 = vsel %vm374_vm0, %v435_v21, %v436_v22  ;;  %vm551_vm1 = vcmask 1045504   ;;  %v555_v6 = vrot.slane %v2876_v17, 2 }
  0x2d   : > { %2104 = vrot.lane.b32.xlu1 %v3013_v47, %s2773_s8  ;;  %v3076_v47 = vld [vmem:[%s2840_s30 + $0x130] sm:$0x3]  ;;  %4314 = vst [vmem:[#allocation18_spill] sm:$0xff] %v3096_v33  ;;  %v552_v10 = vrot.slane %v2867_v12, 2  ;;  %vm1363_vm2 = vcmask 48128   ;;  %vm1330_vm3 = vcmask 23552  }
  0x2e   : > { %2099 = vrot.lane.b32.xlu0 %v3029_v59, %s2773_s8  ;;  %v438_v59 = vrot.slane %v3076_v47, 1  ;;  %vm1396_vm4 = vcmask 72704   ;;  %vm1429_vm5 = vcmask 97280   ;;  %vm1678_vm6 = vcmask 1044480  }
  0x2f   : > { %vm1462_vm7 = vcmask 121856   ;;  %vm1495_vm8 = vcmask 146432   ;;  %vm1528_vm9 = vcmask 171008   ;;  %vm1561_vm10 = vcmask 195584  }
  0x30   : > { %v439_v11 = vsel %vm374_vm0, %v436_v22, %v438_v59  ;;  %vm1629_vm11 = vcmask 220160  }
  0x31   : > { %v3119_v59 = vpack.i.bf16 %v439_v11, %v437_v55  ;;  %v575_v11 = vrot.slane %v2850_v3, 2  ;;  %v572_v55 = vrot.slane %v2844_v1, 2  ;;  %v570_v3 = vrot.slane %v2902_v30, 2 }
  0x33   : > { %2124 = vrot.lane.b32.xlu2 %v3051_v29, %s2773_s8  ;;  %v442_v29 = vsel %vm374_vm0, %v440_v34, %v441_v20  ;;  %v3106_v34 = vld [vmem:[%s2840_s30 + $0x168] sm:$0xff]  ;;  %v3109_v20 = vld [vmem:[%s2840_s30 + $0x170] sm:$0xff]  ;;  %4316 = vst [vmem:[#allocation20_spill] sm:$0xff] %v3119_v59 }
  0x34   : > { %v3103_v32 = vpack.i.bf16 %v444_v46, %v442_v29  ;;  %v450_v21 = vrot.slane %v3106_v34, 1  ;;  %v451_v22 = vrot.slane %v3109_v20, 1  ;;  %v453_v46 = vrot.slane %v3112_v53, 1 }
  0x35   : > { %2119 = vrot.lane.b32.xlu1 %v3067_v56, %s2773_s8  ;;  %v560_v56 = vrot.slane %v2918_v37, 2  ;;  %v559_v37 = vsel %vm551_vm1, %v557_v35, %v558_v54 }
  0x36   : > { %2114 = vrot.lane.b32.xlu0 %v3083_v5, %s2773_s8  ;;  %4315 = vst [vmem:[#allocation19_spill] sm:$0xff] %v3103_v32  ;;  %v553_v5 = vrot.slane %v2870_v13, 2 }
  0x37   : > { %v561_v29 = vsel %vm551_vm1, %v558_v54, %v560_v56  ;;  %v452_v56 = vsel %vm374_vm0, %v450_v21, %v451_v22  ;;  %v454_v54 = vsel %vm374_vm0, %v451_v22, %v453_v46  ;;  %v563_v22 = vrot.slane %v2859_v8, 2 }
  0x38   : > { %v554_v17 = vsel %vm551_vm1, %v552_v10, %v553_v5  ;;  %v556_v12 = vsel %vm551_vm1, %v553_v5, %v555_v6  ;;  %v3133_v35 = vpack.i.bf16 %v561_v29, %v559_v37  ;;  %v567_v10 = vrot.slane %v2893_v25, 2 }
  0x39   : > { %v568_v5 = vrot.slane %v2896_v26, 2  ;;  %v565_v6 = vrot.slane %v2862_v9, 2  ;;  %v3145_v37 = vpack.i.bf16 %v454_v54, %v452_v56  ;;  %v590_v54 = vrot.slane %v2954_v58, 2 }
  0x3a   : > { %v578_v58 = vrot.slane %v2882_v19, 2 }
  0x3b   : > { %2139 = vrot.lane.b32.xlu2 %v3096_v33, %s2773_s8  ;;  %v573_v33 = vrot.slane %v2847_v2, 2  ;;  %4317 = vst [vmem:[#allocation21_spill] sm:$0xff] %v3145_v37  ;;  %v569_v30 = vsel %vm551_vm1, %v567_v10, %v568_v5  ;;  %v571_v9 = vsel %vm551_vm1, %v568_v5, %v570_v3  ;;  %v583_v10 = vrot.slane %v2965_v0, 2 }
  0x3c   : > { %v585_v5 = vrot.slane %v2968_v4, 2 }
  0x3d   : > { %2134 = vrot.lane.b32.xlu1 %v3103_v32, %s2773_s8  ;;  %v2148_v32 = vpack.i.bf16 %v556_v12, %v554_v17  ;;  %v574_v29 = vsel %vm551_vm1, %v572_v55, %v573_v33  ;;  %v576_v21 = vsel %vm551_vm1, %v573_v33, %v575_v11  ;;  %v562_v12 = vrot.slane %v2856_v7, 2 }
  0x3e   : > { %2129 = vrot.lane.b32.xlu0 %v3119_v59, %s2773_s8  ;;  %v3156_v46 = vpack.i.bf16 %v576_v21, %v574_v29  ;;  %v587_v17 = vrot.slane %v2942_v52, 2  ;;  %v566_v33 = vsel %vm551_vm1, %v563_v22, %v565_v6  ;;  %v588_v11 = vrot.slane %v2951_v57, 2 }
  0x3f   : > { %v564_v56 = vsel %vm551_vm1, %v562_v12, %v563_v22  ;;  %v582_v55 = vrot.slane %v2962_v63, 2  ;;  %v577_v29 = vrot.slane %v2879_v18, 2  ;;  %v580_v12 = vrot.slane %v2890_v24, 2 }
  0x40   : > { %4318 = vst [vmem:[#allocation22_spill] sm:$0xff] %v3156_v46  ;;  %v3170_v3 = vpack.i.bf16 %v566_v33, %v564_v56  ;;  %v589_v6 = vsel %vm551_vm1, %v587_v17, %v588_v11  ;;  %v591_v21 = vsel %vm551_vm1, %v588_v11, %v590_v54  ;;  %v586_v22 = vsel %vm551_vm1, %v583_v10, %v585_v5 }
  0x41   : > { %v584_v4 = vsel %vm551_vm1, %v582_v55, %v583_v10  ;;  %v603_v17 = vrot.slane %v3005_v40, 2  ;;  %v579_v56 = vsel %vm551_vm1, %v577_v29, %v578_v58  ;;  %v581_v24 = vsel %vm551_vm1, %v578_v58, %v580_v12 }
  0x42   : > { %v605_v33 = vrot.slane %v3008_v41, 2  ;;  %v3190_v11 = vpack.i.bf16 %v586_v22, %v584_v4  ;;  %v597_v54 = vrot.slane %v3016_v49, 2  ;;  %v598_v55 = vrot.slane %v3019_v50, 2 }
  0x43   : > { %2154 = vrot.lane.b32.xlu2 %v3133_v35, %s2774_s9  ;;  %v600_v10 = vrot.slane %v3022_v51, 2  ;;  %v3197_v5 = vpack.i.bf16 %v581_v24, %v579_v56  ;;  %v593_v41 = vrot.slane %v2928_v43, 2  ;;  %v595_v58 = vrot.slane %v2936_v48, 2 }
  0x44   : > { %4320 = vst [vmem:[#allocation24_spill] sm:$0xff] %v3190_v11  ;;  %v606_v29 = vsel %vm551_vm1, %v603_v17, %v605_v33  ;;  %v599_v51 = vsel %vm551_vm1, %v597_v54, %v598_v55  ;;  %v617_v22 = vrot.slane %v3056_v38, 2  ;;  %v620_v56 = vrot.slane %v3062_v45, 2 }
  0x45   : > { %2149 = vrot.lane.b32.xlu1 %v2148_v32, %s2774_s9  ;;  %v3163_v32 = vpack.i.bf16 %v571_v9, %v569_v30  ;;  %v3183_v30 = vpack.i.bf16 %v591_v21, %v589_v6  ;;  %v602_v9 = vrot.slane %v3002_v39, 2  ;;  %4321 = vst [vmem:[#allocation25_spill] sm:$0xff] %v3197_v5  ;;  %v592_v21 = vrot.slane %v2925_v42, 2 }
  0x46   : > { %2144 = vrot.lane.b32.xlu0 %v3145_v37, %s2773_s8  ;;  %v601_v12 = vsel %vm551_vm1, %v598_v55, %v600_v10  ;;  %v596_v48 = vsel %vm551_vm1, %v593_v41, %v595_v58  ;;  %v612_v33 = vrot.slane %v3070_v60, 2  ;;  %v613_v54 = vrot.slane %v3073_v62, 2 }
  0x47   : > { %4319 = vst [vmem:[#allocation23_spill] sm:$0xff] %v3183_v30  ;;  %v604_v6 = vsel %vm551_vm1, %v602_v9, %v603_v17  ;;  %v618_v9 = vrot.slane %v3059_v44, 2  ;;  %v594_v17 = vsel %vm551_vm1, %v592_v21, %v593_v41  ;;  %v3217_v24 = vpack.i.bf16 %v601_v12, %v599_v51 }
  0x48   : > { %v3210_v4 = vpack.i.bf16 %v606_v29, %v604_v6  ;;  %v615_v55 = vrot.slane %v3076_v47, 2  ;;  %v3224_v10 = vpack.i.bf16 %v596_v48, %v594_v17  ;;  %v607_v21 = vrot.slane %v2983_v23, 2 }
  0x49   : > { %4323 = vst [vmem:[#allocation27_spill] sm:$0xff] %v3217_v24  ;;  %v619_v6 = vsel %vm551_vm1, %v617_v22, %v618_v9  ;;  %v621_v29 = vsel %vm551_vm1, %v618_v9, %v620_v56  ;;  %v608_v45 = vrot.slane %v2986_v27, 2  ;;  %v610_v41 = vrot.slane %v2991_v28, 2 }
  0x4a   : > { %4322 = vst [vmem:[#allocation26_spill] sm:$0xff] %v3210_v4  ;;  %v614_v47 = vsel %vm551_vm1, %v612_v33, %v613_v54  ;;  %v616_v58 = vsel %vm551_vm1, %v613_v54, %v615_v55  ;;  %v3237_v51 = vpack.i.bf16 %v621_v29, %v619_v6  ;;  %v627_v28 = vrot.slane %v3106_v34, 2 }
  0x4b   : > { %2169 = vrot.lane.b32.xlu2 %v3156_v46, %s2774_s9  ;;  %4324 = vst [vmem:[#allocation28_spill] sm:$0xff] %v3224_v10  ;;  %v609_v12 = vsel %vm551_vm1, %v607_v21, %v608_v45  ;;  %v611_v22 = vsel %vm551_vm1, %v608_v45, %v610_v41  ;;  %v3241_v9 = vpack.i.bf16 %v616_v58, %v614_v47  ;;  %v628_v17 = vrot.slane %v3109_v20, 2 }
  0x4c   : > { %v630_v48 = vrot.slane %v3112_v53, 2  ;;  %v3248_v56 = vpack.i.bf16 %v611_v22, %v609_v12  ;;  %v622_v33 = vrot.slane %v3037_v14, 2  ;;  %v623_v54 = vrot.slane %v3040_v15, 2 }
  0x4d   : > { %2164 = vrot.lane.b32.xlu1 %v3163_v32, %s2774_s9  ;;  %4325 = vst [vmem:[#allocation29_spill] sm:$0xff] %v3241_v9  ;;  %v625_v55 = vrot.slane %v3045_v16, 2  ;;  %v629_v6 = vsel %vm551_vm1, %v627_v28, %v628_v17  ;;  %v2228_v53 = vpack.i.bf16 %v2915_v36, %v2905_v31  ;;  %v2243_v47 = vpack.i.bf16 %v2847_v2, %v2844_v1 }
  0x4e   : > { %2159 = vrot.lane.b32.xlu0 %v3170_v3, %s2774_s9  ;;  %4326 = vst [vmem:[#allocation30_spill] sm:$0xff] %v3248_v56  ;;  %v631_v29 = vsel %vm551_vm1, %v628_v17, %v630_v48  ;;  %v624_v21 = vsel %vm551_vm1, %v622_v33, %v623_v54  ;;  %v3276_v58 = vpack.i.bf16 %v2896_v26, %v2893_v25 }
  0x4f   : > { %v626_v45 = vsel %vm551_vm1, %v623_v54, %v625_v55  ;;  %v3263_v41 = vpack.i.bf16 %v631_v29, %v629_v6  ;;  %v3281_v12 = vpack.i.bf16 %v2859_v8, %v2856_v7  ;;  %v2258_v28 = vpack.i.bf16 %v2951_v57, %v2942_v52 }
  0x50   : > { %v3266_v16 = vpack.i.bf16 %v626_v45, %v624_v21  ;;  %v2253_v17 = vpack.i.bf16 %v2965_v0, %v2962_v63  ;;  %v2248_v48 = vpack.i.bf16 %v2882_v19, %v2879_v18  ;;  %v2273_v54 = vpack.i.bf16 %v3005_v40, %v3002_v39 }
  0x51   : > { %4327 = vst [vmem:[#allocation31_spill] sm:$0xff] %v3263_v41  ;;  %v2268_v55 = vpack.i.bf16 %v3019_v50, %v3016_v49  ;;  %v3307_v6 = vpack.i.bf16 %v2928_v43, %v2925_v42  ;;  %v2283_v21 = vpack.i.bf16 %v3073_v62, %v3070_v60  ;;  %v2278_v45 = vpack.i.bf16 %v2986_v27, %v2983_v23 }
  0x53   : > { %2184 = vrot.lane.b32.xlu2 %v3183_v30, %s2774_s9  ;;  %4328 = vst [vmem:[#allocation32_spill] sm:$0xff] %v3307_v6 }
  0x55   : > { %2179 = vrot.lane.b32.xlu1 %v3190_v11, %s2774_s9 }
  0x56   : > { %2174 = vrot.lane.b32.xlu0 %v3197_v5, %s2774_s9 }
  0x5b   : > { %2199 = vrot.lane.b32.xlu2 %v3210_v4, %s2774_s9 }
  0x5d   : > { %2194 = vrot.lane.b32.xlu1 %v3217_v24, %s2774_s9 }
  0x5e   : > { %2189 = vrot.lane.b32.xlu0 %v3224_v10, %s2774_s9 }
  0x63   : > { %2214 = vrot.lane.b32.xlu2 %v3237_v51, %s2774_s9 }
  0x65   : > { %2209 = vrot.lane.b32.xlu1 %v3241_v9, %s2774_s9 }
  0x66   : > { %2204 = vrot.lane.b32.xlu0 %v3248_v56, %s2774_s9  ;;  %v3344_v56 = vpack.i.bf16 %v3109_v20, %v3106_v34 }
  0x68   : > { %4332 = vst [vmem:[#allocation36_spill] sm:$0xff] %v3344_v56 }
  0x6b   : > { %2229 = vrot.lane.b32.xlu2 %v2228_v53, %s2775_s10  ;;  %v3316_v53 = vpack.i.bf16 %v3059_v44, %v3056_v38 }
  0x6d   : > { %2224 = vrot.lane.b32.xlu1 %v3263_v41, %s2774_s9 }
  0x6e   : > { %2219 = vrot.lane.b32.xlu0 %v3266_v16, %s2774_s9 }
  0x73   : > { %2244 = vrot.lane.b32.xlu2 %v2243_v47, %s2775_s10  ;;  %v3325_v47 = vld [vmem:[%s2840_s30 + $0x180] sm:$0xff] }
  0x74   : > { %4329 = vst [vmem:[#allocation33_spill] sm:$0xff] %v3325_v47 }
  0x75   : > { %2239 = vrot.lane.b32.xlu1 %v3276_v58, %s2775_s10  ;;  %v3285_v22 = vpop.permute.xlu2 %2089 }
  0x76   : > { %2234 = vrot.lane.b32.xlu0 %v3281_v12, %s2775_s10 }
  0x7b   : > { %2259 = vrot.lane.b32.xlu2 %v2258_v28, %s2775_s10  ;;  %v3328_v28 = vld [vmem:[%s2840_s30 + $0x188] sm:$0xff] }
  0x7c   : > { %4330 = vst [vmem:[#allocation34_spill] sm:$0xff] %v3328_v28 }
  0x7d   : > { %2254 = vrot.lane.b32.xlu1 %v2253_v17, %s2775_s10  ;;  %v3297_v33 = vpop.permute.xlu2 %2094 }
  0x7e   : > { %2249 = vrot.lane.b32.xlu0 %v2248_v48, %s2775_s10 }
  0x83   : > { %2274 = vrot.lane.b32.xlu2 %v2273_v54, %s2775_s10  ;;  %v3338_v54 = vpack.i.bf16 %v3328_v28, %v3325_v47 }
  0x85   : > { %2269 = vrot.lane.b32.xlu1 %v2268_v55, %s2775_s10  ;;  %v3310_v29 = vpop.permute.xlu2 %2109  ;;  %4331 = vst [vmem:[#allocation35_spill] sm:$0xff] %v3338_v54 }
  0x86   : > { %2264 = vrot.lane.b32.xlu0 %v3307_v6, %s2775_s10 }
  0x8b   : > { %2289 = vrot.lane.b32.xlu2 %v3316_v53, %s2775_s10 }
  0x8d   : > { %2284 = vrot.lane.b32.xlu1 %v2283_v21, %s2775_s10  ;;  %v3331_v17 = vpop.permute.xlu2 %2124  ;;  %v3350_v21 = vpack.i.bf16 %v3040_v15, %v3037_v14  ;;  %v2091_v14 = vunpack.i.l.bf16 %v3285_v22 }
  0x8e   : > { %2279 = vrot.lane.b32.xlu0 %v2278_v45, %s2775_s10 }
  0x8f   : > { %v3334_v48 = vpop.permute.xlu1 %2079 }
  0x90   : > { %v3340_v55 = vpop.permute.xlu0 %2069 }
  0x93   : > { %2304 = vrot.lane.b32.xlu2 %v3338_v54, %s2775_s10  ;;  %v4333_v54 = vld [vmem:[#allocation8_spill] sm:$0xff] }
  0x95   : > { %2299 = vrot.lane.b32.xlu1 %v3344_v56, %s2775_s10  ;;  %v3354_v45 = vpop.permute.xlu2 %2139 }
  0x96   : > { %2294 = vrot.lane.b32.xlu0 %v3350_v21, %s2775_s10 }
  0x97   : > { %v3358_v11 = vpop.permute.xlu1 %2084 }
  0x98   : > { %v2075_v4 = vpop.permute.xlu0 %2074 }
  0x99   : > { %v2077_v5 = vunpack.i.h.bf16 %v2075_v4  ;;  %v2076_v24 = vunpack.i.l.bf16 %v2075_v4  ;;  %v4334_v4 = vld [vmem:[#allocation10_spill] sm:$0xff] }
  0x9b   : > { %2319 = vrot.lane.b32.xlu2 %v2958_v61, %s2776_s11  ;;  %v1334_v56 = vsel %vm1330_vm3, %v2915_v36, %v2077_v5  ;;  %v1333_v37 = vsel %vm1330_vm3, %v2905_v31, %v2076_v24  ;;  %v4337_v36 = vld [vmem:[#allocation13_spill] sm:$0xff] }
  0x9c   : > { %v4338_v31 = vld [vmem:[#allocation9_spill] sm:$0xff] }
  0x9d   : > { %2314 = vrot.lane.b32.xlu1 %v4333_v54, %s2776_s11  ;;  %v2155_v28 = vpop.permute.xlu2 %2154 }
  0x9e   : > { %v2157_v47 = vunpack.i.h.bf16 %v2155_v28  ;;  %v2156_v46 = vunpack.i.l.bf16 %v2155_v28  ;;  %2309 = vrot.lane.b32.xlu0 %v4334_v4, %s2776_s11  ;;  %v2092_v28 = vunpack.i.h.bf16 %v3285_v22 }
  0x9f   : > { %v2105_v41 = vpop.permute.xlu1 %2104 }
  0xa0   : > { %v3371_v10 = vsel %vm1363_vm2, %v1333_v37, %v2156_v46  ;;  %v3374_v30 = vsel %vm1363_vm2, %v1334_v56, %v2157_v47  ;;  %v3376_v6 = vpop.permute.xlu0 %2099  ;;  %v1340_v37 = vsel %vm1330_vm3, %v2847_v2, %v2092_v28  ;;  %v1339_v46 = vsel %vm1330_vm3, %v2844_v1, %v2091_v14  ;;  %v4339_v56 = vld [vmem:[#allocation7_spill] sm:$0xff] }
  0xa1   : > { %4335 = vst [vmem:[#allocation8_spill] sm:$0xff] %v3371_v10  ;;  %v4341_v10 = vld [vmem:[#allocation17_spill] sm:$0xff]  ;;  %v4342_v2 = vld [vmem:[#allocation11_spill] sm:$0xff] }
  0xa2   : > { %4336 = vst [vmem:[#allocation10_spill] sm:$0xff] %v3374_v30  ;;  %v2107_v30 = vunpack.i.h.bf16 %v2105_v41 }
  0xa3   : > { %2334 = vrot.lane.b32.xlu2 %v4337_v36, %s2776_s11 }
  0xa5   : > { %2329 = vrot.lane.b32.xlu1 %v4338_v31, %s2776_s11  ;;  %v2170_v5 = vpop.permute.xlu2 %2169 }
  0xa6   : > { %v2172_v24 = vunpack.i.h.bf16 %v2170_v5  ;;  %v2171_v4 = vunpack.i.l.bf16 %v2170_v5  ;;  %2324 = vrot.lane.b32.xlu0 %v4339_v56, %s2776_s11  ;;  %v2106_v5 = vunpack.i.l.bf16 %v2105_v41 }
  0xa7   : > { %v2120_v47 = vpop.permute.xlu1 %2119 }
  0xa8   : > { %v3391_v22 = vsel %vm1363_vm2, %v1340_v37, %v2172_v24  ;;  %v3394_v36 = vsel %vm1363_vm2, %v1339_v46, %v2171_v4  ;;  %v3396_v31 = vpop.permute.xlu0 %2114  ;;  %v1346_v24 = vsel %vm1330_vm3, %v2951_v57, %v2107_v30  ;;  %v1345_v4 = vsel %vm1330_vm3, %v2942_v52, %v2106_v5  ;;  %v4343_v37 = vld [vmem:[#allocation12_spill] sm:$0xff] }
  0xa9   : > { %4340 = vst [vmem:[#allocation37_spill] sm:$0xff] %v3394_v36  ;;  %v2122_v36 = vunpack.i.h.bf16 %v2120_v47  ;;  %v2072_v52 = vunpack.i.h.bf16 %v3340_v55  ;;  %v2071_v57 = vunpack.i.l.bf16 %v3340_v55 }
  0xab   : > { %2349 = vrot.lane.b32.xlu2 %v4341_v10, %s2776_s11 }
  0xad   : > { %2344 = vrot.lane.b32.xlu1 %v4342_v2, %s2776_s11  ;;  %v2185_v1 = vpop.permute.xlu2 %2184 }
  0xae   : > { %v2187_v14 = vunpack.i.h.bf16 %v2185_v1  ;;  %v2186_v28 = vunpack.i.l.bf16 %v2185_v1  ;;  %2339 = vrot.lane.b32.xlu0 %v4343_v37, %s2776_s11  ;;  %v2121_v1 = vunpack.i.l.bf16 %v2120_v47  ;;  %v4345_v37 = vld [vmem:[#allocation6_spill] sm:$0xff] }
  0xaf   : > { %v2135_v46 = vpop.permute.xlu1 %2134 }
  0xb0   : > { %v3409_v41 = vsel %vm1363_vm2, %v1346_v24, %v2187_v14  ;;  %v3412_v10 = vsel %vm1363_vm2, %v1345_v4, %v2186_v28  ;;  %v3414_v56 = vpop.permute.xlu0 %2129  ;;  %v1352_v28 = vsel %vm1330_vm3, %v3005_v40, %v2122_v36  ;;  %v1351_v47 = vsel %vm1330_vm3, %v3002_v39, %v2121_v1 }
  0xb1   : > { %v1331_v40 = vsel %vm1330_vm3, %v4345_v37, %v2071_v57  ;;  %v2082_v37 = vunpack.i.h.bf16 %v3334_v48  ;;  %v2081_v57 = vunpack.i.l.bf16 %v3334_v48 }
  0xb3   : > { %2364 = vrot.lane.b32.xlu2 %v3316_v53, %s2777_s12 }
  0xb5   : > { %2359 = vrot.lane.b32.xlu1 %v3241_v9, %s2778_s13  ;;  %v2200_v30 = vpop.permute.xlu2 %2199 }
  0xb6   : > { %v2202_v5 = vunpack.i.h.bf16 %v2200_v30  ;;  %v2201_v14 = vunpack.i.l.bf16 %v2200_v30  ;;  %2354 = vrot.lane.b32.xlu0 %v3119_v59, %s2776_s11  ;;  %v1332_v30 = vsel %vm1330_vm3, %v2870_v13, %v2072_v52  ;;  %v2137_v59 = vunpack.i.h.bf16 %v2135_v46 }
  0xb7   : > { %v2150_v53 = vpop.permute.xlu1 %2149 }
  0xb8   : > { %v3429_v24 = vsel %vm1363_vm2, %v1352_v28, %v2202_v5  ;;  %v3432_v55 = vsel %vm1363_vm2, %v1351_v47, %v2201_v14  ;;  %v2152_v4 = vunpack.i.h.bf16 %v2150_v53  ;;  %v2151_v9 = vunpack.i.l.bf16 %v2150_v53  ;;  %v3438_v36 = vpop.permute.xlu0 %2144 }
  0xb9   : > { %4344 = vst [vmem:[#allocation11_spill] sm:$0xff] %v3432_v55  ;;  %v2136_v5 = vunpack.i.l.bf16 %v2135_v46  ;;  %v2087_v14 = vunpack.i.h.bf16 %v3358_v11  ;;  %v2086_v28 = vunpack.i.l.bf16 %v3358_v11  ;;  %v1358_v46 = vsel %vm1330_vm3, %v3059_v44, %v2137_v59  ;;  %v4346_v11 = vld [vmem:[#allocation19_spill] sm:$0xff] }
  0xba   : > { %v1364_v39 = vsel %vm1363_vm2, %v1331_v40, %v2151_v9  ;;  %v1365_v1 = vsel %vm1363_vm2, %v1332_v30, %v2152_v4 }
  0xbb   : > { %2379 = vrot.lane.b32.xlu2 %v3133_v35, %s2778_s13  ;;  %v1357_v35 = vsel %vm1330_vm3, %v3056_v38, %v2136_v5  ;;  %v1338_v48 = vsel %vm1330_vm3, %v2896_v26, %v2087_v14  ;;  %v1337_v44 = vsel %vm1330_vm3, %v2893_v25, %v2086_v28  ;;  %v2102_v14 = vunpack.i.h.bf16 %v3376_v6 }
  0xbc   : > { %v2101_v28 = vunpack.i.l.bf16 %v3376_v6 }
  0xbd   : > { %2374 = vrot.lane.b32.xlu1 %v3237_v51, %s2779_s14  ;;  %v2215_v13 = vpop.permute.xlu2 %2214 }
  0xbe   : > { %v2217_v52 = vunpack.i.h.bf16 %v2215_v13  ;;  %v2216_v9 = vunpack.i.l.bf16 %v2215_v13  ;;  %2369 = vrot.lane.b32.xlu0 %v4346_v11, %s2780_s15 }
  0xbf   : > { %v2165_v47 = vpop.permute.xlu1 %2164 }
  0xc0   : > { %v3457_v53 = vsel %vm1363_vm2, %v1358_v46, %v2217_v52  ;;  %v3460_v4 = vsel %vm1363_vm2, %v1357_v35, %v2216_v9  ;;  %v2167_v30 = vunpack.i.h.bf16 %v2165_v47  ;;  %v2166_v40 = vunpack.i.l.bf16 %v2165_v47  ;;  %v2160_v38 = vpop.permute.xlu0 %2159 }
  0xc1   : > { %v2162_v13 = vunpack.i.h.bf16 %v2160_v38  ;;  %v2161_v55 = vunpack.i.l.bf16 %v2160_v38  ;;  %v1336_v52 = vsel %vm1330_vm3, %v2859_v8, %v2082_v37  ;;  %v1335_v9 = vsel %vm1330_vm3, %v2856_v7, %v2081_v57 }
  0xc2   : > { %v1371_v59 = vsel %vm1363_vm2, %v1338_v48, %v2167_v30  ;;  %v1370_v5 = vsel %vm1363_vm2, %v1337_v44, %v2166_v40  ;;  %v2097_v57 = vunpack.i.h.bf16 %v3297_v33  ;;  %v2096_v46 = vunpack.i.l.bf16 %v3297_v33 }
  0xc3   : > { %2394 = vrot.lane.b32.xlu2 %v3170_v3, %s2779_s14  ;;  %v3475_v26 = vsel %vm1363_vm2, %v1336_v52, %v2162_v13  ;;  %v3478_v25 = vsel %vm1363_vm2, %v1335_v9, %v2161_v55  ;;  %v1344_v30 = vsel %vm1330_vm3, %v2965_v0, %v2102_v14  ;;  %v1343_v40 = vsel %vm1330_vm3, %v2962_v63, %v2101_v28 }
  0xc4   : > { %v2117_v13 = vunpack.i.h.bf16 %v3396_v31  ;;  %v2116_v52 = vunpack.i.l.bf16 %v3396_v31 }
  0xc5   : > { %2389 = vrot.lane.b32.xlu1 %v4333_v54, %s2780_s15  ;;  %v2230_v8 = vpop.permute.xlu2 %2229 }
  0xc6   : > { %v2232_v37 = vunpack.i.h.bf16 %v2230_v8  ;;  %v2231_v7 = vunpack.i.l.bf16 %v2230_v8  ;;  %2384 = vrot.lane.b32.xlu0 %v3281_v12, %s2777_s12 }
  0xc7   : > { %v2180_v55 = vpop.permute.xlu1 %2179 }
  0xc8   : > { %v3489_v35 = vsel %vm1396_vm4, %v1364_v39, %v2231_v7  ;;  %v3492_v6 = vsel %vm1396_vm4, %v1365_v1, %v2232_v37  ;;  %v2182_v47 = vunpack.i.h.bf16 %v2180_v55  ;;  %v2181_v54 = vunpack.i.l.bf16 %v2180_v55  ;;  %v2175_v48 = vpop.permute.xlu0 %2174 }
  0xc9   : > { %v2177_v44 = vunpack.i.h.bf16 %v2175_v48  ;;  %v2176_v38 = vunpack.i.l.bf16 %v2175_v48  ;;  %v1342_v39 = vsel %vm1330_vm3, %v2882_v19, %v2097_v57  ;;  %v1341_v1 = vsel %vm1330_vm3, %v2879_v18, %v2096_v46 }
  0xca   : > { %v1376_v33 = vsel %vm1363_vm2, %v1343_v40, %v2181_v54  ;;  %v1377_v12 = vsel %vm1363_vm2, %v1344_v30, %v2182_v47  ;;  %v2112_v18 = vunpack.i.h.bf16 %v3310_v29  ;;  %v1349_v57 = vsel %vm1330_vm3, %v3016_v49, %v2116_v52 }
  0xcb   : > { %2409 = vrot.lane.b32.xlu2 %v3350_v21, %s2777_s12  ;;  %v3507_v0 = vsel %vm1363_vm2, %v1342_v39, %v2177_v44  ;;  %v3510_v63 = vsel %vm1363_vm2, %v1341_v1, %v2176_v38  ;;  %v2111_v21 = vunpack.i.l.bf16 %v3310_v29  ;;  %v2132_v54 = vunpack.i.h.bf16 %v3414_v56  ;;  %v4347_v44 = vld [vmem:[#allocation18_spill] sm:$0xff] }
  0xcc   : > { %v2131_v30 = vunpack.i.l.bf16 %v3414_v56 }
  0xcd   : > { %2404 = vrot.lane.b32.xlu1 %v3237_v51, %s2778_s13  ;;  %v2245_v19 = vpop.permute.xlu2 %2244  ;;  %v1350_v51 = vsel %vm1330_vm3, %v3019_v50, %v2117_v13  ;;  %v1356_v52 = vsel %vm1330_vm3, %v3073_v62, %v2132_v54 }
  0xce   : > { %v2247_v9 = vunpack.i.h.bf16 %v2245_v19  ;;  %v2246_v14 = vunpack.i.l.bf16 %v2245_v19  ;;  %2399 = vrot.lane.b32.xlu0 %v4346_v11, %s2776_s11  ;;  %v1355_v19 = vsel %vm1330_vm3, %v3070_v60, %v2131_v30 }
  0xcf   : > { %v2195_v28 = vpop.permute.xlu1 %2194 }
  0xd0   : > { %v3521_v8 = vsel %vm1396_vm4, %v1370_v5, %v2246_v14  ;;  %v3524_v37 = vsel %vm1396_vm4, %v1371_v59, %v2247_v9  ;;  %v2197_v31 = vunpack.i.h.bf16 %v2195_v28  ;;  %v2196_v7 = vunpack.i.l.bf16 %v2195_v28  ;;  %v2190_v46 = vpop.permute.xlu0 %2189 }
  0xd1   : > { %v2192_v55 = vunpack.i.h.bf16 %v2190_v46  ;;  %v2191_v47 = vunpack.i.l.bf16 %v2190_v46  ;;  %v1348_v5 = vsel %vm1330_vm3, %v2928_v43, %v2112_v18  ;;  %v1347_v59 = vsel %vm1330_vm3, %v2925_v42, %v2111_v21 }
  0xd2   : > { %v1382_v29 = vsel %vm1363_vm2, %v1349_v57, %v2196_v7  ;;  %v1383_v11 = vsel %vm1363_vm2, %v1350_v51, %v2197_v31  ;;  %v2127_v42 = vunpack.i.h.bf16 %v3331_v17  ;;  %v2147_v28 = vunpack.i.h.bf16 %v3438_v36 }
  0xd3   : > { %2424 = vrot.lane.b32.xlu2 %v3170_v3, %s2778_s13  ;;  %v3539_v50 = vsel %vm1363_vm2, %v1348_v5, %v2192_v55  ;;  %v3542_v49 = vsel %vm1363_vm2, %v1347_v59, %v2191_v47  ;;  %v2126_v3 = vunpack.i.l.bf16 %v3331_v17  ;;  %v2146_v31 = vunpack.i.l.bf16 %v3438_v36 }
  0xd4   : > { %v2141_v57 = vunpack.i.l.bf16 %v3354_v45 }
  0xd5   : > { %2419 = vrot.lane.b32.xlu1 %v3266_v16, %s2779_s14  ;;  %v2260_v43 = vpop.permute.xlu2 %2259  ;;  %v1361_v59 = vsel %vm1330_vm3, %v3106_v34, %v2146_v31 }
  0xd6   : > { %v2262_v40 = vunpack.i.h.bf16 %v2260_v43  ;;  %v2261_v48 = vunpack.i.l.bf16 %v2260_v43  ;;  %2414 = vrot.lane.b32.xlu0 %v4347_v44, %s2780_s15 }
  0xd7   : > { %v2210_v38 = vpop.permute.xlu1 %2209 }
  0xd8   : > { %v3553_v39 = vsel %vm1396_vm4, %v1376_v33, %v2261_v48  ;;  %v3556_v1 = vsel %vm1396_vm4, %v1377_v12, %v2262_v40  ;;  %v2212_v56 = vunpack.i.h.bf16 %v2210_v38  ;;  %v2211_v13 = vunpack.i.l.bf16 %v2210_v38  ;;  %v2205_v9 = vpop.permute.xlu0 %2204  ;;  %v4349_v48 = vld [vmem:[#allocation32_spill] sm:$0xff] }
  0xd9   : > { %v2207_v18 = vunpack.i.h.bf16 %v2205_v9  ;;  %v2206_v21 = vunpack.i.l.bf16 %v2205_v9  ;;  %v1354_v33 = vsel %vm1330_vm3, %v2986_v27, %v2127_v42  ;;  %v1353_v12 = vsel %vm1330_vm3, %v2983_v23, %v2126_v3 }
  0xda   : > { %v1388_v17 = vsel %vm1363_vm2, %v1355_v19, %v2211_v13  ;;  %v1389_v14 = vsel %vm1363_vm2, %v1356_v52, %v2212_v56  ;;  %v2142_v23 = vunpack.i.h.bf16 %v3354_v45 }
  0xdb   : > { %2439 = vrot.lane.b32.xlu2 %v3163_v32, %s2779_s14  ;;  %v3571_v62 = vsel %vm1363_vm2, %v1354_v33, %v2207_v18  ;;  %v3574_v60 = vsel %vm1363_vm2, %v1353_v12, %v2206_v21 }
  0xdd   : > { %2434 = vrot.lane.b32.xlu1 %v2958_v61, %s2780_s15  ;;  %v2275_v27 = vpop.permute.xlu2 %2274  ;;  %v1362_v61 = vsel %vm1330_vm3, %v3109_v20, %v2147_v28  ;;  %v4351_v28 = vld [vmem:[#allocation8_spill] sm:$0xff] }
  0xde   : > { %v2277_v7 = vunpack.i.h.bf16 %v2275_v27  ;;  %v2276_v51 = vunpack.i.l.bf16 %v2275_v27  ;;  %2429 = vrot.lane.b32.xlu0 %v3276_v58, %s2777_s12 }
  0xdf   : > { %v2225_v46 = vpop.permute.xlu1 %2224 }
  0xe0   : > { %v3585_v55 = vsel %vm1396_vm4, %v1382_v29, %v2276_v51  ;;  %v3588_v47 = vsel %vm1396_vm4, %v1383_v11, %v2277_v7  ;;  %v2227_v36 = vunpack.i.h.bf16 %v2225_v46  ;;  %v2226_v5 = vunpack.i.l.bf16 %v2225_v46  ;;  %v2220_v54 = vpop.permute.xlu0 %2219  ;;  %v4348_v11 = vld [vmem:[#allocation14_spill] sm:$0xff] }
  0xe1   : > { %v2222_v30 = vunpack.i.h.bf16 %v2220_v54  ;;  %v2221_v43 = vunpack.i.l.bf16 %v2220_v54  ;;  %v1360_v29 = vsel %vm1330_vm3, %v3040_v15, %v2142_v23  ;;  %v1359_v40 = vsel %vm1330_vm3, %v4348_v11, %v2141_v57  ;;  %v4350_v15 = vld [vmem:[#allocation23_spill] sm:$0xff]  ;;  %v4357_v11 = vld [vmem:[#allocation36_spill] sm:$0xff] }
  0xe2   : > { %v1394_v45 = vsel %vm1363_vm2, %v1361_v59, %v2226_v5  ;;  %v1395_v58 = vsel %vm1363_vm2, %v1362_v61, %v2227_v36  ;;  %v4354_v54 = vld [vmem:[#allocation31_spill] sm:$0xff] }
  0xe3   : > { %2454 = vrot.lane.b32.xlu2 %v4342_v2, %s2780_s15  ;;  %v3603_v20 = vsel %vm1363_vm2, %v1360_v29, %v2222_v30  ;;  %v3606_v34 = vsel %vm1363_vm2, %v1359_v40, %v2221_v43 }
  0xe5   : > { %2449 = vrot.lane.b32.xlu1 %v4349_v48, %s2777_s12  ;;  %v2290_v42 = vpop.permute.xlu2 %2289 }
  0xe6   : > { %v2292_v3 = vunpack.i.h.bf16 %v2290_v42  ;;  %v2291_v38 = vunpack.i.l.bf16 %v2290_v42  ;;  %2444 = vrot.lane.b32.xlu0 %v4350_v15, %s2778_s13 }
  0xe7   : > { %v2240_v56 = vpop.permute.xlu1 %2239 }
  0xe8   : > { %v3613_v13 = vsel %vm1396_vm4, %v1388_v17, %v2291_v38  ;;  %v3616_v2 = vsel %vm1396_vm4, %v1389_v14, %v2292_v3  ;;  %v2242_v52 = vunpack.i.h.bf16 %v2240_v56  ;;  %v2241_v19 = vunpack.i.l.bf16 %v2240_v56  ;;  %v2235_v9 = vpop.permute.xlu0 %2234  ;;  %v4352_v14 = vld [vmem:[#allocation10_spill] sm:$0xff]  ;;  %v2709_v56 = vld [vmem:[%s2840_s30 + $0x60] sm:$0xff] }
  0xe9   : > { %v2237_v33 = vunpack.i.h.bf16 %v2235_v9  ;;  %v2236_v12 = vunpack.i.l.bf16 %v2235_v9 }
  0xea   : > { %v1401_v18 = vsel %vm1396_vm4, %v3478_v25, %v2241_v19  ;;  %v1402_v21 = vsel %vm1396_vm4, %v3475_v26, %v2242_v52  ;;  %v4353_v26 = vld [vmem:[#allocation28_spill] sm:$0xff]  ;;  %v2710_v52 = vld [vmem:[%s2840_s30 + $0x68] sm:$0xff] }
  0xeb   : > { %2469 = vrot.lane.b32.xlu2 %v3266_v16, %s2778_s13  ;;  %v3626_v17 = vsel %vm1396_vm4, %v4351_v28, %v2236_v12  ;;  %v3630_v31 = vsel %vm1396_vm4, %v4352_v14, %v2237_v33  ;;  %v2493_v19 = vpack.i.bf16 %v2710_v52, %v2709_v56  ;;  %v4358_v28 = vld [vmem:[#allocation7_spill] sm:$0xff] }
  0xed   : > { %2464 = vrot.lane.b32.xlu1 %v4347_v44, %s2776_s11  ;;  %v2305_v25 = vpop.permute.xlu2 %2304 }
  0xee   : > { %v2307_v27 = vunpack.i.h.bf16 %v2305_v25  ;;  %v2306_v7 = vunpack.i.l.bf16 %v2305_v25  ;;  %2459 = vrot.lane.b32.xlu0 %v4353_v26, %s2779_s14 }
  0xef   : > { %v2255_v51 = vpop.permute.xlu1 %2254 }
  0xf0   : > { %v3637_v16 = vsel %vm1396_vm4, %v1394_v45, %v2306_v7  ;;  %v3640_v23 = vsel %vm1396_vm4, %v1395_v58, %v2307_v27  ;;  %v2257_v57 = vunpack.i.h.bf16 %v2255_v51  ;;  %v2256_v46 = vunpack.i.l.bf16 %v2255_v51  ;;  %v2250_v36 = vpop.permute.xlu0 %2249  ;;  %v4355_v58 = vld [vmem:[#allocation37_spill] sm:$0xff]  ;;  %v2711_v7 = vld [vmem:[%s2840_s30 + $0xd8] sm:$0xff] }
  0xf1   : > { %v2252_v61 = vunpack.i.h.bf16 %v2250_v36  ;;  %v2251_v59 = vunpack.i.l.bf16 %v2250_v36  ;;  %v2712_v51 = vld [vmem:[%s2840_s30 + $0xe0] sm:$0xff] }
  0xf2   : > { %v1407_v5 = vsel %vm1396_vm4, %v3510_v63, %v2256_v46  ;;  %v1408_v44 = vsel %vm1396_vm4, %v3507_v0, %v2257_v57  ;;  %v4356_v63 = vld [vmem:[#allocation21_spill] sm:$0xff]  ;;  %v2513_v57 = vpack.i.bf16 %v2712_v51, %v2711_v7  ;;  %v4367_v7 = vld [vmem:[#allocation27_spill] sm:$0xff] }
  0xf3   : > { %2484 = vrot.lane.b32.xlu2 %v4354_v54, %s2779_s14  ;;  %v3650_v45 = vsel %vm1396_vm4, %v3391_v22, %v2252_v61  ;;  %v3654_v30 = vsel %vm1396_vm4, %v4355_v58, %v2251_v59 }
  0xf5   : > { %2479 = vrot.lane.b32.xlu1 %v4356_v63, %s2780_s15  ;;  %v2320_v0 = vpop.permute.xlu2 %2319 }
  0xf6   : > { %v2322_v43 = vunpack.i.h.bf16 %v2320_v0  ;;  %v2321_v29 = vunpack.i.l.bf16 %v2320_v0  ;;  %2474 = vrot.lane.b32.xlu0 %v4357_v11, %s2777_s12  ;;  %v322_v0 = vld [vmem:[%s2840_s30 + $0x190] sm:$0x3] }
  0xf7   : > { %v2270_v40 = vpop.permute.xlu1 %2269 }
  0xf8   : > { %v3661_v48 = vsel %vm1429_vm5, %v1401_v18, %v2321_v29  ;;  %v3664_v22 = vsel %vm1429_vm5, %v1402_v21, %v2322_v43  ;;  %v2272_v42 = vunpack.i.h.bf16 %v2270_v40  ;;  %v2271_v3 = vunpack.i.l.bf16 %v2270_v40  ;;  %v2265_v38 = vpop.permute.xlu0 %2264  ;;  %v4364_v29 = vld [vmem:[#allocation22_spill] sm:$0xff]  ;;  %v4365_v40 = vld [vmem:[#allocation33_spill] sm:$0xff] }
  0xf9   : > { %v2267_v12 = vunpack.i.h.bf16 %v2265_v38  ;;  %v2266_v18 = vunpack.i.l.bf16 %v2265_v38  ;;  %v830_v38 = vrot.slane %v322_v0, 1 }
  0xfa   : > { %v1413_v9 = vsel %vm1396_vm4, %v3542_v49, %v2271_v3  ;;  %v1414_v33 = vsel %vm1396_vm4, %v3539_v50, %v2272_v42  ;;  %v827_v42 = vrot.slane %v4365_v40, 1  ;;  %v4366_v3 = vld [vmem:[#allocation34_spill] sm:$0xff] }
  0xfb   : > { %2499 = vrot.lane.b32.xlu2 %v4358_v28, %s2780_s15  ;;  %v3676_v21 = vsel %vm1396_vm4, %v3409_v41, %v2267_v12  ;;  %v3680_v14 = vsel %vm1396_vm4, %v3412_v10, %v2266_v18 }
  0xfd   : > { %2494 = vrot.lane.b32.xlu1 %v2493_v19, %s2777_s12  ;;  %v2335_v25 = vpop.permute.xlu2 %2334 }
  0xfe   : > { %v2337_v49 = vunpack.i.h.bf16 %v2335_v25  ;;  %v2336_v27 = vunpack.i.l.bf16 %v2335_v25  ;;  %2489 = vrot.lane.b32.xlu0 %v3163_v32, %s2778_s13  ;;  %v4362_v32 = vld [vmem:[#allocation11_spill] sm:$0xff] }
  0xff   : > { %v3685_v50 = vpop.permute.xlu1 %2284 }
 0x100   : > { %v3690_v41 = vsel %vm1429_vm5, %v1407_v5, %v2336_v27  ;;  %v3693_v10 = vsel %vm1429_vm5, %v1408_v44, %v2337_v49  ;;  %v2280_v46 = vpop.permute.xlu0 %2279 }
 0x101   : > { %4359 = vst [vmem:[#allocation6_spill] sm:$0xff] %v3690_v41  ;;  %v2282_v36 = vunpack.i.h.bf16 %v2280_v46  ;;  %v2281_v61 = vunpack.i.l.bf16 %v2280_v46 }
 0x102   : > { %4360 = vst [vmem:[#allocation19_spill] sm:$0xff] %v3693_v10 }
 0x103   : > { %2514 = vrot.lane.b32.xlu2 %v2513_v57, %s2777_s12  ;;  %v3698_v59 = vsel %vm1396_vm4, %v3429_v24, %v2282_v36  ;;  %v3702_v58 = vsel %vm1396_vm4, %v4362_v32, %v2281_v61  ;;  %v828_v24 = vrot.slane %v4366_v3, 1  ;;  %v2781_v57 = vmov 65535   ;;  %v4368_v36 = vld [vmem:[#allocation17_spill] sm:$0xff] }
 0x104   : > { %4361 = vst [vmem:[#allocation18_spill] sm:$0xff] %v3698_v59  ;;  %v1679_v46 = vsel %vm1678_vm6, 4294967295, %v2781_v57 }
 0x105   : > { %4363 = vst [vmem:[#allocation14_spill] sm:$0xff] %v3702_v58  ;;  %2509 = vrot.lane.b32.xlu1 %v4353_v26, %s2778_s13  ;;  %v2350_v5 = vpop.permute.xlu2 %2349 }
 0x106   : > { %v2352_v44 = vunpack.i.h.bf16 %v2350_v5  ;;  %v2351_v43 = vunpack.i.l.bf16 %v2350_v5  ;;  %2504 = vrot.lane.b32.xlu0 %v4364_v29, %s2779_s14 }
 0x107   : > { %v2300_v11 = vpop.permute.xlu1 %2299 }
 0x108   : > { %v3712_v56 = vsel %vm1429_vm5, %v1413_v9, %v2351_v43  ;;  %v3715_v52 = vsel %vm1429_vm5, %v1414_v33, %v2352_v44  ;;  %v2302_v19 = vunpack.i.h.bf16 %v2300_v11  ;;  %v2301_v26 = vunpack.i.l.bf16 %v2300_v11  ;;  %v2295_v12 = vpop.permute.xlu0 %2294  ;;  %v2034_v43 = vld [vmem:[%s4241_s1] sm:$0xff] }
 0x109   : > { %v2297_v25 = vunpack.i.h.bf16 %v2295_v12  ;;  %v2296_v49 = vunpack.i.l.bf16 %v2295_v12  ;;  %v829_v9 = vsel %vm374_vm0, %v827_v42, %v828_v24  ;;  %v831_v33 = vsel %vm374_vm0, %v828_v24, %v830_v38  ;;  %v4369_v38 = vld [vmem:[#allocation35_spill] sm:$0xff]  ;;  %v2713_v12 = vld [vmem:[%s2840_s30 + $0x78] sm:$0xff] }
 0x10a   : > { %v3719_v18 = vsel %vm1396_vm4, %v3606_v34, %v2301_v26  ;;  %v3723_v28 = vsel %vm1396_vm4, %v3603_v20, %v2302_v19  ;;  %v2011_v20 = vld [vmem:[%s4241_s1 + $0x8] sm:$0xf]  ;;  %v3752_v32 = vpack.i.bf16 %v831_v33, %v829_v9  ;;  %v928_v11 = vrot.slane %v4365_v40, 2 }
 0x10b   : > { %2529 = vrot.lane.b32.xlu2 %v4356_v63, %s2776_s11  ;;  %v3731_v27 = vsel %vm1396_vm4, %v3457_v53, %v2297_v25  ;;  %v3735_v34 = vsel %vm1396_vm4, %v3460_v4, %v2296_v49  ;;  %v2035_v63 = vld [vmem:[%s4241_s1 + $0x8] sm:$0x30]  ;;  %v1680_v4 = vsel %vm551_vm1, %v1679_v46, 0  ;;  %v929_v42 = vrot.slane %v4366_v3, 2  ;;  %v2714_v25 = vld [vmem:[%s2840_s30 + $0x80] sm:$0xff] }
 0x10c   : > { %v2012_v53 = vor.u32 %v2035_v63, %v2011_v20  ;;  %v931_v24 = vrot.slane %v322_v0, 2  ;;  %v2558_v49 = vpack.i.bf16 %v2714_v25, %v2713_v12  ;;  %v2715_v25 = vld [vmem:[%s2840_s30 + $0xf0] sm:$0xff] }
 0x10d   : > { %2524 = vrot.lane.b32.xlu1 %v4367_v7, %s2779_s14  ;;  %v3745_v51 = vpop.permute.xlu2 %2364  ;;  %v930_v3 = vsel %vm551_vm1, %v928_v11, %v929_v42 }
 0x10e   : > { %2519 = vrot.lane.b32.xlu0 %v4368_v36, %s2780_s15  ;;  %v1682_v5 = vand.u32 %v2012_v53, %v1680_v4  ;;  %v932_v0 = vsel %vm551_vm1, %v929_v42, %v931_v24  ;;  %v4371_v42 = vld [vmem:[#allocation9_spill] sm:$0xff] }
 0x10f   : > { %v3750_v61 = vpop.permute.xlu1 %2314  ;;  %v3782_v57 = vpack.i.bf16 %v932_v0, %v930_v3 }
 0x110   : > { %v3754_v44 = vpop.permute.xlu0 %2309  ;;  %2037 = vmatpush.bf16.msra.mxu3 %v1682_v5  ;;  %1690 = vmatpush.bf16.msra.mxu0 %v1682_v5 }
 0x111   : > { %2036 = vmatpush.bf16.msra.mxu1 %v1682_v5 }
 0x113   : > { %2544 = vrot.lane.b32.xlu2 %v3752_v32, %s2780_s15 }
 0x114   : > { %2039 = vmatpush.bf16.msra.mxu3 %v2034_v43  ;;  %1691 = vmatpush.bf16.msra.mxu0 %v2034_v43 }
 0x115   : > { %2539 = vrot.lane.b32.xlu1 %v4369_v38, %s2777_s12  ;;  %v3765_v19 = vpop.permute.xlu2 %2379  ;;  %2038 = vmatpush.bf16.msra.mxu1 %v2034_v43  ;;  %v2286_v38 = vunpack.i.l.bf16 %v3685_v50 }
 0x116   : > { %2534 = vrot.lane.b32.xlu0 %v4354_v54, %s2778_s13 }
 0x117   : > { %v2330_v26 = vpop.permute.xlu1 %2329 }
 0x118   : > { %v2332_v9 = vunpack.i.h.bf16 %v2330_v26  ;;  %v2331_v40 = vunpack.i.l.bf16 %v2330_v26  ;;  %v2325_v33 = vpop.permute.xlu0 %2324 }
 0x119   : > { %v2327_v54 = vunpack.i.h.bf16 %v2325_v33  ;;  %v2326_v53 = vunpack.i.l.bf16 %v2325_v33 }
 0x11a   : > { %v3775_v20 = vsel %vm1429_vm5, %v3654_v30, %v2331_v40  ;;  %v3779_v63 = vsel %vm1429_vm5, %v3650_v45, %v2332_v9  ;;  %v1419_v40 = vsel %vm1396_vm4, %v3574_v60, %v2286_v38  ;;  %v2366_v60 = vunpack.i.l.bf16 %v3745_v51 }
 0x11b   : > { %2559 = vrot.lane.b32.xlu2 %v2558_v49, %s2777_s12  ;;  %v3786_v46 = vsel %vm1429_vm5, %v3524_v37, %v2327_v54  ;;  %v3790_v4 = vsel %vm1429_vm5, %v3521_v8, %v2326_v53  ;;  %v2716_v49 = vld [vmem:[%s2840_s30 + $0xf8] sm:$0xff]  ;;  %v2311_v38 = vunpack.i.l.bf16 %v3754_v44 }
 0x11c   : > { %v2578_v9 = vpack.i.bf16 %v2716_v49, %v2715_v25  ;;  %v323_v54 = vld [vmem:[%s2840_s30 + $0x198] sm:$0xff] }
 0x11d   : > { %2554 = vrot.lane.b32.xlu1 %v4364_v29, %s2778_s13  ;;  %v3794_v30 = vpop.permute.xlu2 %2394  ;;  %v4370_v29 = vld [vmem:[#allocation25_spill] sm:$0xff]  ;;  %v1229_v59 = vrot.slane %v323_v54, 2 }
 0x11e   : > { %2549 = vrot.lane.b32.xlu0 %v3782_v57, %s2779_s14 }
 0x11f   : > { %v2345_v45 = vpop.permute.xlu1 %2344 }
 0x120   : > { %v2347_v36 = vunpack.i.h.bf16 %v2345_v45  ;;  %v2346_v5 = vunpack.i.l.bf16 %v2345_v45  ;;  %v3798_v43 = vpop.permute.xlu0 %2339 }
 0x122   : > { %v3802_v37 = vsel %vm1429_vm5, %v3680_v14, %v2346_v5  ;;  %v3806_v8 = vsel %vm1429_vm5, %v3676_v21, %v2347_v36  ;;  %v2287_v14 = vunpack.i.h.bf16 %v3685_v50  ;;  %v324_v50 = vld [vmem:[%s2840_s30 + $0x1a0] sm:$0xff]  ;;  %v4373_v36 = vld [vmem:[#allocation16_spill] sm:$0xff] }
 0x123   : > { %2574 = vrot.lane.b32.xlu2 %v4367_v7, %s2778_s13  ;;  %v4372_v7 = vld [vmem:[#allocation26_spill] sm:$0xff]  ;;  %v1129_v41 = vrot.slane %v324_v50, 1 }
 0x124   : > { %v1420_v3 = vsel %vm1396_vm4, %v3571_v62, %v2287_v14  ;;  %v325_v14 = vld [vmem:[%s2840_s30 + $0x1a8] sm:$0x3] }
 0x125   : > { %2569 = vrot.lane.b32.xlu1 %v4370_v29, %s2779_s14  ;;  %v3812_v11 = vpop.permute.xlu2 %2409 }
 0x126   : > { %2564 = vrot.lane.b32.xlu0 %v4371_v42, %s2780_s15  ;;  %v2367_v42 = vunpack.i.h.bf16 %v3745_v51 }
 0x127   : > { %v2360_v24 = vpop.permute.xlu1 %2359 }
 0x128   : > { %v2355_v21 = vpop.permute.xlu0 %2354  ;;  %v2362_v0 = vunpack.i.h.bf16 %v2360_v24  ;;  %v2361_v33 = vunpack.i.l.bf16 %v2360_v24  ;;  %v2603_v24 = vpack.i.bf16 %v324_v50, %v323_v54 }
 0x129   : > { %v2357_v26 = vunpack.i.h.bf16 %v2355_v21  ;;  %v2356_v12 = vunpack.i.l.bf16 %v2355_v21 }
 0x12b   : > { %2589 = vrot.lane.b32.xlu2 %v4372_v7, %s2779_s14  ;;  %v1452_v53 = vsel %vm1429_vm5, %v1419_v40, %v2356_v12  ;;  %v1453_v45 = vsel %vm1429_vm5, %v1420_v3, %v2357_v26  ;;  %v1230_v40 = vrot.slane %v324_v50, 2 }
 0x12c   : > { %v1485_v21 = vsel %vm1462_vm7, %v1452_v53, %v2361_v33  ;;  %v1486_v26 = vsel %vm1462_vm7, %v1453_v45, %v2362_v0  ;;  %v1128_v53 = vrot.slane %v323_v54, 1  ;;  %v1131_v45 = vrot.slane %v325_v14, 1 }
 0x12d   : > { %2584 = vrot.lane.b32.xlu1 %v4373_v36, %s2780_s15  ;;  %v3832_v5 = vpop.permute.xlu2 %2424  ;;  %v1518_v58 = vsel %vm1495_vm8, %v1485_v21, %v2366_v60  ;;  %v1519_v10 = vsel %vm1495_vm8, %v1486_v26, %v2367_v42  ;;  %v2381_v54 = vunpack.i.l.bf16 %v3765_v19 }
 0x12e   : > { %2579 = vrot.lane.b32.xlu0 %v2578_v9, %s2777_s12  ;;  %v1232_v9 = vrot.slane %v325_v14, 2  ;;  %v1130_v14 = vsel %vm374_vm0, %v1128_v53, %v1129_v41  ;;  %v1132_v21 = vsel %vm374_vm0, %v1129_v41, %v1131_v45 }
 0x12f   : > { %v2375_v62 = vpop.permute.xlu1 %2374  ;;  %v2608_v41 = vpack.i.bf16 %v1132_v21, %v1130_v14 }
 0x130   : > { %v2377_v12 = vunpack.i.h.bf16 %v2375_v62  ;;  %v2376_v25 = vunpack.i.l.bf16 %v2375_v62  ;;  %v2370_v49 = vpop.permute.xlu0 %2369  ;;  %v2312_v62 = vunpack.i.h.bf16 %v3754_v44 }
 0x131   : > { %v2372_v3 = vunpack.i.h.bf16 %v2370_v49  ;;  %v2371_v51 = vunpack.i.l.bf16 %v2370_v49 }
 0x133   : > { %2604 = vrot.lane.b32.xlu2 %v2603_v24, %s2777_s12  ;;  %v1551_v33 = vsel %vm1528_vm9, %v1518_v58, %v2371_v51  ;;  %v1552_v0 = vsel %vm1528_vm9, %v1519_v10, %v2372_v3  ;;  %v1231_v24 = vsel %vm551_vm1, %v1229_v59, %v1230_v40  ;;  %v1233_v58 = vsel %vm551_vm1, %v1230_v40, %v1232_v9 }
 0x134   : > { %v1584_v49 = vsel %vm1561_vm10, %v1551_v33, %v2376_v25  ;;  %v1585_v60 = vsel %vm1561_vm10, %v1552_v0, %v2377_v12  ;;  %v2382_v10 = vunpack.i.h.bf16 %v3765_v19  ;;  %v1431_v59 = vsel %vm1429_vm5, %v3492_v6, %v2312_v62 }
 0x135   : > { %2599 = vrot.lane.b32.xlu1 %v3782_v57, %s2778_s13  ;;  %v3851_v42 = vpop.permute.xlu2 %2439  ;;  %v1605_v50 = vpack.c.bf16 %v1585_v60, %v1584_v49  ;;  %v1430_v57 = vsel %vm1429_vm5, %v3489_v35, %v2311_v38  ;;  %v2613_v19 = vpack.i.bf16 %v1233_v58, %v1231_v24  ;;  %v2397_v40 = vunpack.i.h.bf16 %v3794_v30  ;;  %v4374_v24 = vld [vmem:[#allocation24_spill] sm:$0xff]  ;;  %v2717_v58 = vld [vmem:[%s2840_s30 + $0x90] sm:$0xff] }
 0x136   : > { %2594 = vrot.lane.b32.xlu0 %v3752_v32, %s2776_s11  ;;  %v2396_v32 = vunpack.i.l.bf16 %v3794_v30  ;;  %v1463_v35 = vsel %vm1462_vm7, %v1430_v57, %v2381_v54  ;;  %v1464_v38 = vsel %vm1462_vm7, %v1431_v59, %v2382_v10  ;;  %v2718_v10 = vld [vmem:[%s2840_s30 + $0x98] sm:$0xff]  ;;  %v4375_v59 = vld [vmem:[#allocation13_spill] sm:$0xff] }
 0x137   : > { %v2390_v44 = vpop.permute.xlu1 %2389  ;;  %2024 = vmatmul.msk.bf16.vlgmr.msra.gmra.mxu3 %vm1629_vm11, %v1605_v50  ;;  %v2623_v54 = vpack.i.bf16 %v2718_v10, %v2717_v58 }
 0x138   : > { %v2392_v26 = vunpack.i.h.bf16 %v2390_v44  ;;  %v2391_v12 = vunpack.i.l.bf16 %v2390_v44  ;;  %v2385_v25 = vpop.permute.xlu0 %2384 }
 0x139   : > { %v2387_v3 = vunpack.i.h.bf16 %v2385_v25  ;;  %v2386_v51 = vunpack.i.l.bf16 %v2385_v25  ;;  %v2411_v25 = vunpack.i.l.bf16 %v3812_v11 }
 0x13b   : > { %2619 = vrot.lane.b32.xlu2 %v4370_v29, %s2778_s13  ;;  %v1496_v6 = vsel %vm1495_vm8, %v1463_v35, %v2386_v51  ;;  %v1497_v9 = vsel %vm1495_vm8, %v1464_v38, %v2387_v3 }
 0x13c   : > { %v1529_v30 = vsel %vm1528_vm9, %v1496_v6, %v2391_v12  ;;  %v1530_v0 = vsel %vm1528_vm9, %v1497_v9, %v2392_v26  ;;  %v2412_v12 = vunpack.i.h.bf16 %v3812_v11  ;;  %v2316_v11 = vunpack.i.l.bf16 %v3750_v61 }
 0x13d   : > { %2614 = vrot.lane.b32.xlu1 %v2613_v19, %s2779_s14  ;;  %v3875_v33 = vpop.permute.xlu2 %2454  ;;  %v1562_v53 = vsel %vm1561_vm10, %v1529_v30, %v2396_v32  ;;  %v1563_v45 = vsel %vm1561_vm10, %v1530_v0, %v2397_v40  ;;  %v2719_v40 = vld [vmem:[%s2840_s30 + $0x108] sm:$0xff]  ;;  %v2720_v32 = vld [vmem:[%s2840_s30 + $0x110] sm:$0xff] }
 0x13e   : > { %2609 = vrot.lane.b32.xlu0 %v2608_v41, %s2780_s15  ;;  %v1594_v62 = vpack.c.bf16 %v1563_v45, %v1562_v53  ;;  %v2648_v3 = vpack.i.bf16 %v2720_v32, %v2719_v40  ;;  %v2317_v45 = vunpack.i.h.bf16 %v3750_v61  ;;  %v1432_v61 = vsel %vm1429_vm5, %v3626_v17, %v2316_v11 }
 0x13f   : > { %v2405_v29 = vpop.permute.xlu1 %2404 }
 0x140   : > { %v2400_v49 = vpop.permute.xlu0 %2399  ;;  %2013 = vmatmul.msk.bf16.vlgmr.msra.gmra.mxu0 %vm1629_vm11, %v1594_v62  ;;  %v2407_v44 = vunpack.i.h.bf16 %v2405_v29  ;;  %v2406_v57 = vunpack.i.l.bf16 %v2405_v29 }
 0x141   : > { %v2402_v60 = vunpack.i.h.bf16 %v2400_v49  ;;  %v2401_v50 = vunpack.i.l.bf16 %v2400_v49 }
 0x143   : > { %2634 = vrot.lane.b32.xlu2 %v4374_v24, %s2779_s14  ;;  %v1454_v14 = vsel %vm1429_vm5, %v3613_v13, %v2401_v50  ;;  %v1455_v21 = vsel %vm1429_vm5, %v3616_v2, %v2402_v60  ;;  %v2427_v60 = vunpack.i.h.bf16 %v3832_v5  ;;  %v2426_v50 = vunpack.i.l.bf16 %v3832_v5 }
 0x144   : > { %v1487_v13 = vsel %vm1462_vm7, %v1454_v14, %v2406_v57  ;;  %v1488_v51 = vsel %vm1462_vm7, %v1455_v21, %v2407_v44  ;;  %v2442_v14 = vunpack.i.h.bf16 %v3851_v42  ;;  %v2441_v5 = vunpack.i.l.bf16 %v3851_v42 }
 0x145   : > { %2629 = vrot.lane.b32.xlu1 %v4375_v59, %s2780_s15  ;;  %v3893_v26 = vpop.permute.xlu2 %2469  ;;  %v1520_v9 = vsel %vm1495_vm8, %v1487_v13, %v2411_v25  ;;  %v1521_v30 = vsel %vm1495_vm8, %v1488_v51, %v2412_v12  ;;  %v1465_v59 = vsel %vm1462_vm7, %v1432_v61, %v2426_v50  ;;  %v4376_v25 = vld [vmem:[#allocation30_spill] sm:$0xff]  ;;  %v2342_v51 = vunpack.i.h.bf16 %v3798_v43 }
 0x146   : > { %2624 = vrot.lane.b32.xlu0 %v2623_v54, %s2777_s12  ;;  %v2456_v50 = vunpack.i.l.bf16 %v3875_v33 }
 0x147   : > { %v2420_v19 = vpop.permute.xlu1 %2419 }
 0x148   : > { %v2422_v2 = vunpack.i.h.bf16 %v2420_v19  ;;  %v2421_v35 = vunpack.i.l.bf16 %v2420_v19  ;;  %v2415_v38 = vpop.permute.xlu0 %2414 }
 0x149   : > { %v2417_v41 = vunpack.i.h.bf16 %v2415_v38  ;;  %v2416_v6 = vunpack.i.l.bf16 %v2415_v38 }
 0x14b   : > { %2649 = vrot.lane.b32.xlu2 %v2648_v3, %s2777_s12  ;;  %v1553_v0 = vsel %vm1528_vm9, %v1520_v9, %v2416_v6  ;;  %v1554_v53 = vsel %vm1528_vm9, %v1521_v30, %v2417_v41  ;;  %v4377_v3 = vld [vmem:[#allocation15_spill] sm:$0xff]  ;;  %v2721_v9 = vld [vmem:[%s2840_s30 + $0xa8] sm:$0xff] }
 0x14c   : > { %v1586_v29 = vsel %vm1561_vm10, %v1553_v0, %v2421_v35  ;;  %v1587_v62 = vsel %vm1561_vm10, %v1554_v53, %v2422_v2  ;;  %v2341_v2 = vunpack.i.l.bf16 %v3798_v43  ;;  %v2722_v30 = vld [vmem:[%s2840_s30 + $0xb0] sm:$0xff]  ;;  %v1443_v43 = vsel %vm1429_vm5, %v3556_v1, %v2342_v51 }
 0x14d   : > { %2644 = vrot.lane.b32.xlu1 %v4372_v7, %s2778_s13  ;;  %v1606_v49 = vpack.c.bf16 %v1587_v62, %v1586_v29  ;;  %v3917_v58 = vpop.permute.xlu2 %2484  ;;  %v1433_v7 = vsel %vm1429_vm5, %v3630_v31, %v2317_v45  ;;  %v2668_v11 = vpack.i.bf16 %v2722_v30, %v2721_v9 }
 0x14e   : > { %2639 = vrot.lane.b32.xlu0 %v4373_v36, %s2776_s11  ;;  %v1466_v12 = vsel %vm1462_vm7, %v1433_v7, %v2427_v60  ;;  %v1442_v0 = vsel %vm1429_vm5, %v3553_v39, %v2341_v2  ;;  %v2457_v60 = vunpack.i.h.bf16 %v3875_v33  ;;  %v2723_v39 = vld [vmem:[%s2840_s30 + $0x120] sm:$0xff]  ;;  %v2486_v2 = vunpack.i.l.bf16 %v3917_v58 }
 0x14f   : > { %v2435_v10 = vpop.permute.xlu1 %2434  ;;  %2025 = vmatmul.msk.bf16.gmra.mxu3 %vm1629_vm11, %v1606_v49  ;;  %v4378_v49 = vld [vmem:[#allocation12_spill] sm:$0xff] }
 0x150   : > { %v2437_v54 = vunpack.i.h.bf16 %v2435_v10  ;;  %v2436_v44 = vunpack.i.l.bf16 %v2435_v10  ;;  %v2430_v57 = vpop.permute.xlu0 %2429  ;;  %v2724_v10 = vld [vmem:[%s2840_s30 + $0x128] sm:$0xff] }
 0x151   : > { %v2432_v21 = vunpack.i.h.bf16 %v2430_v57  ;;  %v2431_v36 = vunpack.i.l.bf16 %v2430_v57  ;;  %v2693_v61 = vpack.i.bf16 %v2724_v10, %v2723_v39 }
 0x153   : > { %2664 = vrot.lane.b32.xlu2 %v4374_v24, %s2778_s13  ;;  %v1498_v17 = vsel %vm1495_vm8, %v1465_v59, %v2431_v36  ;;  %v1499_v31 = vsel %vm1495_vm8, %v1466_v12, %v2432_v21 }
 0x154   : > { %v1531_v42 = vsel %vm1528_vm9, %v1498_v17, %v2436_v44  ;;  %v1532_v19 = vsel %vm1528_vm9, %v1499_v31, %v2437_v54  ;;  %v2472_v31 = vunpack.i.h.bf16 %v3893_v26 }
 0x155   : > { %2659 = vrot.lane.b32.xlu1 %v4376_v25, %s2779_s14  ;;  %v1564_v40 = vsel %vm1561_vm10, %v1531_v42, %v2441_v5  ;;  %v1565_v32 = vsel %vm1561_vm10, %v1532_v19, %v2442_v14  ;;  %v3942_v35 = vpop.permute.xlu2 %2499  ;;  %v2471_v42 = vunpack.i.l.bf16 %v3893_v26 }
 0x156   : > { %2654 = vrot.lane.b32.xlu0 %v4377_v3, %s2780_s15  ;;  %v1595_v13 = vpack.c.bf16 %v1565_v32, %v1564_v40  ;;  %v2502_v10 = vunpack.i.h.bf16 %v3942_v35 }
 0x157   : > { %v2450_v24 = vpop.permute.xlu1 %2449 }
 0x158   : > { %v2445_v38 = vpop.permute.xlu0 %2444  ;;  %2014 = vmatmul.msk.bf16.gmra.mxu0 %vm1629_vm11, %v1595_v13  ;;  %v2452_v53 = vunpack.i.h.bf16 %v2450_v24  ;;  %v2451_v45 = vunpack.i.l.bf16 %v2450_v24 }
 0x159   : > { %v2447_v41 = vunpack.i.h.bf16 %v2445_v38  ;;  %v2446_v6 = vunpack.i.l.bf16 %v2445_v38 }
 0x15b   : > { %2679 = vrot.lane.b32.xlu2 %v4350_v15, %s2779_s14  ;;  %v1475_v29 = vsel %vm1462_vm7, %v1442_v0, %v2446_v6  ;;  %v1476_v62 = vsel %vm1462_vm7, %v1443_v43, %v2447_v41  ;;  %v4380_v43 = vld [vmem:[#allocation20_spill] sm:$0xff] }
 0x15c   : > { %v1508_v1 = vsel %vm1495_vm8, %v1475_v29, %v2451_v45  ;;  %v1509_v7 = vsel %vm1495_vm8, %v1476_v62, %v2452_v53 }
 0x15d   : > { %2674 = vrot.lane.b32.xlu1 %v4378_v49, %s2780_s15  ;;  %v3964_v14 = vpop.permute.xlu2 %2514  ;;  %v1541_v5 = vsel %vm1528_vm9, %v1508_v1, %v2456_v50  ;;  %v1542_v21 = vsel %vm1528_vm9, %v1509_v7, %v2457_v60 }
 0x15e   : > { %2669 = vrot.lane.b32.xlu0 %v2668_v11, %s2777_s12 }
 0x15f   : > { %v2465_v15 = vpop.permute.xlu1 %2464 }
 0x160   : > { %v2460_v54 = vpop.permute.xlu0 %2459  ;;  %v2467_v33 = vunpack.i.h.bf16 %v2465_v15  ;;  %v2466_v36 = vunpack.i.l.bf16 %v2465_v15 }
 0x161   : > { %v2462_v44 = vunpack.i.h.bf16 %v2460_v54  ;;  %v2461_v57 = vunpack.i.l.bf16 %v2460_v54 }
 0x162   : > { %v1456_v40 = vsel %vm1429_vm5, %v3735_v34, %v2466_v36  ;;  %v1457_v32 = vsel %vm1429_vm5, %v3731_v27, %v2467_v33  ;;  %v4379_v27 = vld [vmem:[#allocation29_spill] sm:$0xff] }
 0x163   : > { %2694 = vrot.lane.b32.xlu2 %v2693_v61, %s2777_s12  ;;  %v1574_v59 = vsel %vm1561_vm10, %v1541_v5, %v2461_v57  ;;  %v1575_v12 = vsel %vm1561_vm10, %v1542_v21, %v2462_v44  ;;  %v1490_v41 = vsel %vm1462_vm7, %v1457_v32, %v2472_v31  ;;  %v2501_v61 = vunpack.i.l.bf16 %v3942_v35 }
 0x164   : > { %v1600_v17 = vpack.c.bf16 %v1575_v12, %v1574_v59  ;;  %v2516_v31 = vunpack.i.l.bf16 %v3964_v14 }
 0x165   : > { %2689 = vrot.lane.b32.xlu1 %v4376_v25, %s2778_s13  ;;  %v2487_v25 = vunpack.i.h.bf16 %v3917_v58  ;;  %v3988_v9 = vpop.permute.xlu2 %2529 }
 0x166   : > { %2684 = vrot.lane.b32.xlu0 %v4377_v3, %s2776_s11  ;;  %2019 = vmatmul.msk.bf16.vlgmr.msra.gmra.mxu1 %vm1629_vm11, %v1600_v17  ;;  %v1489_v3 = vsel %vm1462_vm7, %v1456_v40, %v2471_v42  ;;  %v2517_v17 = vunpack.i.h.bf16 %v3964_v14 }
 0x167   : > { %v2480_v19 = vpop.permute.xlu1 %2479 }
 0x168   : > { %v2482_v24 = vunpack.i.h.bf16 %v2480_v19  ;;  %v2481_v13 = vunpack.i.l.bf16 %v2480_v19  ;;  %v2475_v51 = vpop.permute.xlu0 %2474 }
 0x169   : > { %v2477_v26 = vunpack.i.h.bf16 %v2475_v51  ;;  %v2476_v38 = vunpack.i.l.bf16 %v2475_v51 }
 0x16b   : > { %v1522_v6 = vsel %vm1495_vm8, %v1489_v3, %v2476_v38  ;;  %v1523_v34 = vsel %vm1495_vm8, %v1490_v41, %v2477_v26 }
 0x16c   : > { %v1555_v30 = vsel %vm1528_vm9, %v1522_v6, %v2481_v13  ;;  %v1556_v11 = vsel %vm1528_vm9, %v1523_v34, %v2482_v24  ;;  %v2532_v34 = vunpack.i.h.bf16 %v3988_v9 }
 0x16d   : > { %2704 = vrot.lane.b32.xlu1 %v4379_v27, %s2779_s14  ;;  %v1588_v58 = vsel %vm1561_vm10, %v1555_v30, %v2486_v2  ;;  %v1589_v0 = vsel %vm1561_vm10, %v1556_v11, %v2487_v25  ;;  %v2545_v1 = vpop.permute.xlu2 %2544  ;;  %v2531_v27 = vunpack.i.l.bf16 %v3988_v9 }
 0x16e   : > { %2699 = vrot.lane.b32.xlu0 %v4380_v43, %s2780_s15  ;;  %v1607_v45 = vpack.c.bf16 %v1589_v0, %v1588_v58  ;;  %v2546_v9 = vunpack.i.l.bf16 %v2545_v1 }
 0x16f   : > { %v2495_v53 = vpop.permute.xlu1 %2494  ;;  %v1458_v43 = vsel %vm1429_vm5, %v3719_v18, %v2531_v27 }
 0x170   : > { %v2490_v29 = vpop.permute.xlu0 %2489  ;;  %2026 = vmatmul.msk.bf16.gmra.mxu3 %vm1629_vm11, %v1607_v45  ;;  %v2497_v60 = vunpack.i.h.bf16 %v2495_v53  ;;  %v2496_v50 = vunpack.i.l.bf16 %v2495_v53  ;;  %v1459_v53 = vsel %vm1429_vm5, %v3723_v28, %v2532_v34 }
 0x171   : > { %v2492_v62 = vunpack.i.h.bf16 %v2490_v29  ;;  %v2491_v49 = vunpack.i.l.bf16 %v2490_v29 }
 0x173   : > { %v1467_v15 = vsel %vm1462_vm7, %v3661_v48, %v2491_v49  ;;  %v1468_v39 = vsel %vm1462_vm7, %v3664_v22, %v2492_v62 }
 0x174   : > { %v1500_v54 = vsel %vm1495_vm8, %v1467_v15, %v2496_v50  ;;  %v1501_v44 = vsel %vm1495_vm8, %v1468_v39, %v2497_v60  ;;  %v2547_v60 = vunpack.i.h.bf16 %v2545_v1 }
 0x175   : > { %v1533_v33 = vsel %vm1528_vm9, %v1500_v54, %v2501_v61  ;;  %v1534_v48 = vsel %vm1528_vm9, %v1501_v44, %v2502_v10  ;;  %v2560_v32 = vpop.permute.xlu2 %2559 }
 0x177   : > { %v2510_v7 = vpop.permute.xlu1 %2509 }
 0x178   : > { %v2505_v57 = vpop.permute.xlu0 %2504  ;;  %v2512_v36 = vunpack.i.h.bf16 %v2510_v7  ;;  %v2511_v59 = vunpack.i.l.bf16 %v2510_v7 }
 0x179   : > { %v2507_v5 = vunpack.i.h.bf16 %v2505_v57  ;;  %v2506_v21 = vunpack.i.l.bf16 %v2505_v57 }
 0x17a   : > { %v1477_v19 = vsel %vm1462_vm7, %v3802_v37, %v2511_v59  ;;  %v1478_v40 = vsel %vm1462_vm7, %v3806_v8, %v2512_v36 }
 0x17b   : > { %v1566_v22 = vsel %vm1561_vm10, %v1533_v33, %v2506_v21  ;;  %v1567_v12 = vsel %vm1561_vm10, %v1534_v48, %v2507_v5  ;;  %v1510_v26 = vsel %vm1495_vm8, %v1477_v19, %v2516_v31  ;;  %v1511_v38 = vsel %vm1495_vm8, %v1478_v40, %v2517_v17 }
 0x17c   : > { %v1596_v35 = vpack.c.bf16 %v1567_v12, %v1566_v22  ;;  %v2562_v33 = vunpack.i.h.bf16 %v2560_v32  ;;  %v2561_v48 = vunpack.i.l.bf16 %v2560_v32 }
 0x17d   : > { %v2575_v0 = vpop.permute.xlu2 %2574 }
 0x17e   : > { %2015 = vmatmul.msk.bf16.gmra.mxu0 %vm1629_vm11, %v1596_v35 }
 0x17f   : > { %v2525_v42 = vpop.permute.xlu1 %2524 }
 0x180   : > { %v2527_v24 = vunpack.i.h.bf16 %v2525_v42  ;;  %v2526_v13 = vunpack.i.l.bf16 %v2525_v42  ;;  %v2520_v51 = vpop.permute.xlu0 %2519 }
 0x181   : > { %v2522_v25 = vunpack.i.h.bf16 %v2520_v51  ;;  %v2521_v2 = vunpack.i.l.bf16 %v2520_v51 }
 0x183   : > { %v1543_v14 = vsel %vm1528_vm9, %v1510_v26, %v2521_v2  ;;  %v1544_v3 = vsel %vm1528_vm9, %v1511_v38, %v2522_v25  ;;  %v2577_v25 = vunpack.i.h.bf16 %v2575_v0 }
 0x184   : > { %v1576_v41 = vsel %vm1561_vm10, %v1543_v14, %v2526_v13  ;;  %v1577_v37 = vsel %vm1561_vm10, %v1544_v3, %v2527_v24 }
 0x185   : > { %v1601_v6 = vpack.c.bf16 %v1577_v37, %v1576_v41  ;;  %v2590_v21 = vpop.permute.xlu2 %2589  ;;  %v1480_v27 = vsel %vm1462_vm7, %v3715_v52, %v2577_v25 }
 0x186   : > { %v2592_v41 = vunpack.i.h.bf16 %v2590_v21  ;;  %v2591_v37 = vunpack.i.l.bf16 %v2590_v21 }
 0x187   : > { %v2540_v8 = vpop.permute.xlu1 %2539  ;;  %2020 = vmatmul.msk.bf16.gmra.mxu1 %vm1629_vm11, %v1601_v6 }
 0x188   : > { %v2535_v30 = vpop.permute.xlu0 %2534  ;;  %v2542_v45 = vunpack.i.h.bf16 %v2540_v8  ;;  %v2541_v29 = vunpack.i.l.bf16 %v2540_v8 }
 0x189   : > { %v2537_v11 = vunpack.i.h.bf16 %v2535_v30  ;;  %v2536_v58 = vunpack.i.l.bf16 %v2535_v30 }
 0x18b   : > { %v1491_v62 = vsel %vm1462_vm7, %v1458_v43, %v2536_v58  ;;  %v1492_v49 = vsel %vm1462_vm7, %v1459_v53, %v2537_v11 }
 0x18c   : > { %v1524_v15 = vsel %vm1495_vm8, %v1491_v62, %v2541_v29  ;;  %v1525_v39 = vsel %vm1495_vm8, %v1492_v49, %v2542_v45 }
 0x18d   : > { %v1557_v18 = vsel %vm1528_vm9, %v1524_v15, %v2546_v9  ;;  %v1558_v28 = vsel %vm1528_vm9, %v1525_v39, %v2547_v60  ;;  %v2605_v2 = vpop.permute.xlu2 %2604 }
 0x18e   : > { %v2607_v39 = vunpack.i.h.bf16 %v2605_v2 }
 0x18f   : > { %v2555_v50 = vpop.permute.xlu1 %2554 }
 0x190   : > { %v2550_v10 = vpop.permute.xlu0 %2549  ;;  %v2557_v54 = vunpack.i.h.bf16 %v2555_v50  ;;  %v2556_v44 = vunpack.i.l.bf16 %v2555_v50 }
 0x191   : > { %v2552_v61 = vunpack.i.h.bf16 %v2550_v10  ;;  %v2551_v7 = vunpack.i.l.bf16 %v2550_v10  ;;  %v2606_v10 = vunpack.i.l.bf16 %v2605_v2 }
 0x192   : > { %v1469_v59 = vsel %vm1462_vm7, %v3790_v4, %v2556_v44  ;;  %v1470_v22 = vsel %vm1462_vm7, %v3786_v46, %v2557_v54  ;;  %v2576_v46 = vunpack.i.l.bf16 %v2575_v0 }
 0x193   : > { %v1590_v57 = vsel %vm1561_vm10, %v1557_v18, %v2551_v7  ;;  %v1591_v5 = vsel %vm1561_vm10, %v1558_v28, %v2552_v61  ;;  %v1502_v19 = vsel %vm1495_vm8, %v1469_v59, %v2561_v48  ;;  %v1503_v40 = vsel %vm1495_vm8, %v1470_v22, %v2562_v33 }
 0x194   : > { %v1608_v1 = vpack.c.bf16 %v1591_v5, %v1590_v57  ;;  %v1479_v34 = vsel %vm1462_vm7, %v3712_v56, %v2576_v46 }
 0x195   : > { %v2620_v62 = vpop.permute.xlu2 %2619 }
 0x196   : > { %2027 = vmatmul.msk.bf16.gmra.mxu3 %vm1629_vm11, %v1608_v1  ;;  %v2622_v22 = vunpack.i.h.bf16 %v2620_v62 }
 0x197   : > { %v2570_v36 = vpop.permute.xlu1 %2569 }
 0x198   : > { %v2565_v12 = vpop.permute.xlu0 %2564  ;;  %v2572_v35 = vunpack.i.h.bf16 %v2570_v36  ;;  %v2571_v17 = vunpack.i.l.bf16 %v2570_v36 }
 0x199   : > { %v2567_v31 = vunpack.i.h.bf16 %v2565_v12  ;;  %v2566_v42 = vunpack.i.l.bf16 %v2565_v12  ;;  %v2621_v12 = vunpack.i.l.bf16 %v2620_v62 }
 0x19b   : > { %v1535_v32 = vsel %vm1528_vm9, %v1502_v19, %v2566_v42  ;;  %v1536_v24 = vsel %vm1528_vm9, %v1503_v40, %v2567_v31 }
 0x19c   : > { %v1568_v13 = vsel %vm1561_vm10, %v1535_v32, %v2571_v17  ;;  %v1569_v4 = vsel %vm1561_vm10, %v1536_v24, %v2572_v35 }
 0x19d   : > { %v1597_v51 = vpack.c.bf16 %v1569_v4, %v1568_v13  ;;  %v2635_v21 = vpop.permute.xlu2 %2634  ;;  %v1471_v13 = vsel %vm1462_vm7, %v3775_v20, %v2621_v12  ;;  %v1472_v4 = vsel %vm1462_vm7, %v3779_v63, %v2622_v22 }
 0x19e   : > { %v2637_v19 = vunpack.i.h.bf16 %v2635_v21  ;;  %v2636_v40 = vunpack.i.l.bf16 %v2635_v21 }
 0x19f   : > { %v2585_v26 = vpop.permute.xlu1 %2584  ;;  %2016 = vmatmul.msk.bf16.gmra.mxu0 %vm1629_vm11, %v1597_v51 }
 0x1a0   : > { %v2580_v38 = vpop.permute.xlu0 %2579  ;;  %v2587_v14 = vunpack.i.h.bf16 %v2585_v26  ;;  %v2586_v3 = vunpack.i.l.bf16 %v2585_v26 }
 0x1a1   : > { %v2582_v6 = vunpack.i.h.bf16 %v2580_v38  ;;  %v2581_v8 = vunpack.i.l.bf16 %v2580_v38 }
 0x1a3   : > { %v1512_v30 = vsel %vm1495_vm8, %v1479_v34, %v2581_v8  ;;  %v1513_v11 = vsel %vm1495_vm8, %v1480_v27, %v2582_v6 }
 0x1a4   : > { %v1545_v58 = vsel %vm1528_vm9, %v1512_v30, %v2586_v3  ;;  %v1546_v0 = vsel %vm1528_vm9, %v1513_v11, %v2587_v14  ;;  %v4086_v14 = vld [vmem:[%s4242_s2] ss:$0 sm:$0xff] }
 0x1a5   : > { %v1578_v43 = vsel %vm1561_vm10, %v1545_v58, %v2591_v37  ;;  %v1579_v53 = vsel %vm1561_vm10, %v1546_v0, %v2592_v41  ;;  %v2650_v2 = vpop.permute.xlu2 %2649 }
 0x1a6   : > { %v1602_v45 = vpack.c.bf16 %v1579_v53, %v1578_v43 }
 0x1a7   : > { %v2600_v29 = vpop.permute.xlu1 %2599 }
 0x1a8   : > { %v2595_v49 = vpop.permute.xlu0 %2594  ;;  %2021 = vmatmul.msk.bf16.gmra.mxu1 %vm1629_vm11, %v1602_v45  ;;  %v2602_v60 = vunpack.i.h.bf16 %v2600_v29  ;;  %v2601_v9 = vunpack.i.l.bf16 %v2600_v29 }
 0x1a9   : > { %v2597_v56 = vunpack.i.h.bf16 %v2595_v49  ;;  %v2596_v52 = vunpack.i.l.bf16 %v2595_v49 }
 0x1ab   : > { %v1460_v50 = vsel %vm1429_vm5, %v3637_v16, %v2596_v52  ;;  %v1461_v15 = vsel %vm1429_vm5, %v3640_v23, %v2597_v56  ;;  %v2652_v56 = vunpack.i.h.bf16 %v2650_v2  ;;  %v2651_v52 = vunpack.i.l.bf16 %v2650_v2 }
 0x1ac   : > { %v1493_v7 = vsel %vm1462_vm7, %v1460_v50, %v2601_v9  ;;  %v1494_v18 = vsel %vm1462_vm7, %v1461_v15, %v2602_v60 }
 0x1ad   : > { %v1526_v1 = vsel %vm1495_vm8, %v1493_v7, %v2606_v10  ;;  %v1527_v16 = vsel %vm1495_vm8, %v1494_v18, %v2607_v39  ;;  %v2665_v60 = vpop.permute.xlu2 %2664 }
 0x1af   : > { %v2615_v61 = vpop.permute.xlu1 %2614 }
 0x1b0   : > { %v2610_v28 = vpop.permute.xlu0 %2609  ;;  %v2617_v54 = vunpack.i.h.bf16 %v2615_v61  ;;  %v2616_v44 = vunpack.i.l.bf16 %v2615_v61 }
 0x1b1   : > { %v2612_v57 = vunpack.i.h.bf16 %v2610_v28  ;;  %v2611_v5 = vunpack.i.l.bf16 %v2610_v28 }
 0x1b3   : > { %v1559_v33 = vsel %vm1528_vm9, %v1526_v1, %v2611_v5  ;;  %v1560_v23 = vsel %vm1528_vm9, %v1527_v16, %v2612_v57 }
 0x1b4   : > { %v1592_v48 = vsel %vm1561_vm10, %v1559_v33, %v2616_v44  ;;  %v1593_v36 = vsel %vm1561_vm10, %v1560_v23, %v2617_v54 }
 0x1b5   : > { %v1609_v59 = vpack.c.bf16 %v1593_v36, %v1592_v48  ;;  %v2667_v48 = vunpack.i.h.bf16 %v2665_v60  ;;  %v2666_v36 = vunpack.i.l.bf16 %v2665_v60  ;;  %v2680_v22 = vpop.permute.xlu2 %2679 }
 0x1b7   : > { %v2630_v35 = vpop.permute.xlu1 %2629  ;;  %2028 = vmatmul.msk.bf16.gmra.mxu3 %vm1629_vm11, %v1609_v59 }
 0x1b8   : > { %v2625_v17 = vpop.permute.xlu0 %2624  ;;  %v2632_v31 = vunpack.i.h.bf16 %v2630_v35  ;;  %v2631_v42 = vunpack.i.l.bf16 %v2630_v35 }
 0x1b9   : > { %v2627_v32 = vunpack.i.h.bf16 %v2625_v17  ;;  %v2626_v24 = vunpack.i.l.bf16 %v2625_v17 }
 0x1ba   : > { %v1748_v51 = vpop.f32.mrf.mxu3 }
 0x1bb   : > { %v1504_v25 = vsel %vm1495_vm8, %v1471_v13, %v2626_v24  ;;  %v1505_v46 = vsel %vm1495_vm8, %v1472_v4, %v2627_v32  ;;  %v1749_v8 = vadd.f32 %v4086_v14, %v1748_v51  ;;  %v4381_v32 = vld [vmem:[#allocation6_spill] sm:$0xff]  ;;  %v4382_v13 = vld [vmem:[#allocation19_spill] sm:$0xff] }
 0x1bc   : > { %v1537_v26 = vsel %vm1528_vm9, %v1504_v25, %v2631_v42  ;;  %v1538_v38 = vsel %vm1528_vm9, %v1505_v46, %v2632_v31  ;;  %v1473_v24 = vsel %vm1462_vm7, %v4381_v32, %v2666_v36  ;;  %v1474_v4 = vsel %vm1462_vm7, %v4382_v13, %v2667_v48 }
 0x1bd   : > { %v1693_v3 = vpop.f32.mrf.mxu0  ;;  %v1570_v20 = vsel %vm1561_vm10, %v1537_v26, %v2636_v40  ;;  %v1571_v63 = vsel %vm1561_vm10, %v1538_v38, %v2637_v19  ;;  %v1795_v29 = vmax.f32 %v1749_v8, 0.0  ;;  %v2682_v19 = vunpack.i.h.bf16 %v2680_v22 }
 0x1be   : > { %v1598_v41 = vpack.c.bf16 %v1571_v63, %v1570_v20  ;;  %v1694_v43 = vadd.f32 %v4086_v14, %v1693_v3  ;;  %v2681_v40 = vunpack.i.l.bf16 %v2680_v22 }
 0x1bf   : > { %v2645_v37 = vpop.permute.xlu1 %2644 }
 0x1c0   : > { %v2640_v6 = vpop.permute.xlu0 %2639  ;;  %2017 = vmatmul.msk.bf16.gmra.mxu0 %vm1629_vm11, %v1598_v41  ;;  %v2647_v11 = vunpack.i.h.bf16 %v2645_v37  ;;  %v2646_v58 = vunpack.i.l.bf16 %v2645_v37  ;;  %v1773_v61 = vmax.f32 %v1694_v43, 0.0 }
 0x1c1   : > { %v2642_v34 = vunpack.i.h.bf16 %v2640_v6  ;;  %v2641_v27 = vunpack.i.l.bf16 %v2640_v6 }
 0x1c2   : > { %v1750_v30 = vpop.f32.mrf.mxu3 }
 0x1c3   : > { %v1751_v0 = vadd.f32 %v4086_v14, %v1750_v30  ;;  %v1448_v53 = vsel %vm1429_vm5, %v3585_v55, %v2641_v27  ;;  %v1449_v45 = vsel %vm1429_vm5, %v3588_v47, %v2642_v34  ;;  %v2695_v27 = vpop.permute.xlu2 %2694 }
 0x1c4   : > { %v1481_v15 = vsel %vm1462_vm7, %v1448_v53, %v2646_v58  ;;  %v1482_v39 = vsel %vm1462_vm7, %v1449_v45, %v2647_v11  ;;  %v4383_v11 = vld [vmem:[#allocation14_spill] sm:$0xff]  ;;  %v2697_v45 = vunpack.i.h.bf16 %v2695_v27 }
 0x1c5   : > { %v1796_v62 = vmax.f32 %v1751_v0, 0.0  ;;  %v1695_v49 = vpop.f32.mrf.mxu0  ;;  %v1514_v44 = vsel %vm1495_vm8, %v1481_v15, %v2651_v52  ;;  %v1515_v57 = vsel %vm1495_vm8, %v1482_v39, %v2652_v56  ;;  %v4384_v0 = vld [vmem:[#allocation18_spill] sm:$0xff] }
 0x1c6   : > { %v1696_v9 = vadd.f32 %v4086_v14, %v1695_v49 }
 0x1c7   : > { %v2660_v50 = vpop.permute.xlu1 %2659  ;;  %v4101_v10 = vpack.c.bf16 %v1796_v62, %v1795_v29  ;;  %v2696_v29 = vunpack.i.l.bf16 %v2695_v27 }
 0x1c8   : > { %v1774_v55 = vmax.f32 %v1696_v9, 0.0  ;;  %v2655_v7 = vpop.permute.xlu0 %2654  ;;  %v2662_v18 = vunpack.i.h.bf16 %v2660_v50  ;;  %v2661_v47 = vunpack.i.l.bf16 %v2660_v50 }
 0x1c9   : > { %v2657_v28 = vunpack.i.h.bf16 %v2655_v7  ;;  %v2656_v54 = vunpack.i.l.bf16 %v2655_v7 }
 0x1ca   : > { %v4105_v5 = vpack.c.bf16 %v1774_v55, %v1773_v61 }
 0x1cb   : > { %v1547_v21 = vsel %vm1528_vm9, %v1514_v44, %v2656_v54  ;;  %v1548_v1 = vsel %vm1528_vm9, %v1515_v57, %v2657_v28 }
 0x1cc   : > { %v1580_v16 = vsel %vm1561_vm10, %v1547_v21, %v2661_v47  ;;  %v1581_v33 = vsel %vm1561_vm10, %v1548_v1, %v2662_v18 }
 0x1cd   : > { %v1603_v23 = vpack.c.bf16 %v1581_v33, %v1580_v16 }
 0x1cf   : > { %v2675_v59 = vpop.permute.xlu1 %2674  ;;  %2022 = vmatmul.msk.bf16.gmra.mxu1 %vm1629_vm11, %v1603_v23 }
 0x1d0   : > { %v2670_v12 = vpop.permute.xlu0 %2669  ;;  %v2677_v35 = vunpack.i.h.bf16 %v2675_v59  ;;  %v2676_v17 = vunpack.i.l.bf16 %v2675_v59 }
 0x1d1   : > { %v2672_v31 = vunpack.i.h.bf16 %v2670_v12  ;;  %v2671_v42 = vunpack.i.l.bf16 %v2670_v12 }
 0x1d2   : > { %v1753_v33 = vpop.f32.mrf.mxu3 }
 0x1d3   : > { %v1506_v51 = vsel %vm1495_vm8, %v1473_v24, %v2671_v42  ;;  %v1507_v25 = vsel %vm1495_vm8, %v1474_v4, %v2672_v31 }
 0x1d4   : > { %v1539_v46 = vsel %vm1528_vm9, %v1506_v51, %v2676_v17  ;;  %v1540_v2 = vsel %vm1528_vm9, %v1507_v25, %v2677_v35 }
 0x1d5   : > { %v1698_v26 = vpop.f32.mrf.mxu0  ;;  %v1572_v38 = vsel %vm1561_vm10, %v1539_v46, %v2681_v40  ;;  %v1573_v3 = vsel %vm1561_vm10, %v1540_v2, %v2682_v19 }
 0x1d6   : > { %v1599_v20 = vpack.c.bf16 %v1573_v3, %v1572_v38  ;;  %v1699_v30 = vadd.f32 %v4086_v14, %v1698_v26 }
 0x1d7   : > { %v2690_v63 = vpop.permute.xlu1 %2689 }
 0x1d8   : > { %v2685_v41 = vpop.permute.xlu0 %2684  ;;  %2018 = vmatmul.msk.bf16.gmra.mxu0 %vm1629_vm11, %v1599_v20  ;;  %v2692_v8 = vunpack.i.h.bf16 %v2690_v63  ;;  %v2691_v34 = vunpack.i.l.bf16 %v2690_v63  ;;  %v1775_v60 = vmax.f32 %v1699_v30, 0.0 }
 0x1d9   : > { %v2687_v37 = vunpack.i.h.bf16 %v2685_v41  ;;  %v2686_v6 = vunpack.i.l.bf16 %v2685_v41 }
 0x1da   : > { %v1755_v12 = vpop.f32.mrf.mxu3 }
 0x1db   : > { %v1450_v58 = vsel %vm1429_vm5, %v4383_v11, %v2686_v6  ;;  %v1451_v43 = vsel %vm1429_vm5, %v4384_v0, %v2687_v37 }
 0x1dc   : > { %v1483_v56 = vsel %vm1462_vm7, %v1450_v58, %v2691_v34  ;;  %v1484_v52 = vsel %vm1462_vm7, %v1451_v43, %v2692_v8 }
 0x1dd   : > { %v1700_v53 = vpop.f32.mrf.mxu0  ;;  %v1516_v7 = vsel %vm1495_vm8, %v1483_v56, %v2696_v29  ;;  %v1517_v18 = vsel %vm1495_vm8, %v1484_v52, %v2697_v45  ;;  %v1756_v45 = vadd.f32 %v4086_v14, %v1755_v12 }
 0x1de   : > { %v1701_v62 = vadd.f32 %v4086_v14, %v1700_v53 }
 0x1df   : > { %v2705_v49 = vpop.permute.xlu1 %2704 }
 0x1e0   : > { %v1776_v9 = vmax.f32 %v1701_v62, 0.0  ;;  %v2700_v50 = vpop.permute.xlu0 %2699  ;;  %v2707_v15 = vunpack.i.h.bf16 %v2705_v49  ;;  %v2706_v39 = vunpack.i.l.bf16 %v2705_v49  ;;  %v1754_v49 = vadd.f32 %v4086_v14, %v1753_v33 }
 0x1e1   : > { %v2702_v61 = vunpack.i.h.bf16 %v2700_v50  ;;  %v2701_v55 = vunpack.i.l.bf16 %v2700_v50 }
 0x1e2   : > { %v4133_v47 = vpack.c.bf16 %v1776_v9, %v1775_v60  ;;  %v1798_v60 = vmax.f32 %v1756_v45, 0.0  ;;  %v1797_v50 = vmax.f32 %v1754_v49, 0.0 }
 0x1e3   : > { %v1549_v28 = vsel %vm1528_vm9, %v1516_v7, %v2701_v55  ;;  %v1550_v54 = vsel %vm1528_vm9, %v1517_v18, %v2702_v61  ;;  %v1723_v1 = vpop.f32.mrf.mxu1 }
 0x1e4   : > { %v1582_v44 = vsel %vm1561_vm10, %v1549_v28, %v2706_v39  ;;  %v1583_v57 = vsel %vm1561_vm10, %v1550_v54, %v2707_v15  ;;  %v1724_v35 = vadd.f32 %v4086_v14, %v1723_v1  ;;  %v1817_v39 = vpack.c.bf16 %v1798_v60, %v1797_v50 }
 0x1e5   : > { %v1604_v21 = vpack.c.bf16 %v1583_v57, %v1582_v44 }
 0x1e6   : > { %v1785_v40 = vmax.f32 %v1724_v35, 0.0 }
 0x1e7   : > { %2023 = vmatmul.msk.bf16.gmra.mxu1 %vm1629_vm11, %v1604_v21 }
 0x1eb   : > { %v1725_v16 = vpop.f32.mrf.mxu1 }
 0x1ec   : > { %v1726_v59 = vadd.f32 %v4086_v14, %v1725_v16 }
 0x1ee   : > { %v1786_v42 = vmax.f32 %v1726_v59, 0.0 }
 0x1f0   : > { %v1811_v32 = vpack.c.bf16 %v1786_v42, %v1785_v40 }
 0x1f3   : > { %v1758_v24 = vpop.f32.mrf.mxu3 }
 0x1f4   : > { %v1759_v0 = vadd.f32 %v4086_v14, %v1758_v24 }
 0x1f6   : > { %v1799_v56 = vmax.f32 %v1759_v0, 0.0 }
 0x1fb   : > { %v1703_v13 = vpop.f32.mrf.mxu0  ;;  %v1760_v4 = vpop.f32.mrf.mxu3 }
 0x1fc   : > { %v1761_v30 = vadd.f32 %v4086_v14, %v1760_v4  ;;  %v1704_v12 = vadd.f32 %v4086_v14, %v1703_v13 }
 0x1fe   : > { %v1800_v29 = vmax.f32 %v1761_v30, 0.0 }
 0x200   : > { %v1818_v9 = vpack.c.bf16 %v1800_v29, %v1799_v56 }
 0x203   : > { %v1705_v25 = vpop.f32.mrf.mxu0 }
 0x204   : > { %v1728_v23 = vpop.f32.mrf.mxu1 }
 0x205   : > { %v1729_v48 = vadd.f32 %v4086_v14, %v1728_v23 }
 0x207   : > { %v1787_v17 = vmax.f32 %v1729_v48, 0.0 }
 0x20c   : > { %v1730_v36 = vpop.f32.mrf.mxu1 }
 0x20d   : > { %v1731_v22 = vadd.f32 %v4086_v14, %v1730_v36  ;;  %v1706_v36 = vadd.f32 %v4086_v14, %v1705_v25 }
 0x20f   : > { %v1788_v31 = vmax.f32 %v1731_v22, 0.0 }
 0x211   : > { %v1812_v19 = vpack.c.bf16 %v1788_v31, %v1787_v17  ;;  %v1778_v17 = vmax.f32 %v1706_v36, 0.0 }
 0x213   : > { %1821 = vmatpush.bf16.msrb.mxu1 %v1812_v19  ;;  %v1777_v19 = vmax.f32 %v1704_v12, 0.0 }
 0x215   : > { %v1807_v4 = vpack.c.bf16 %v1778_v17, %v1777_v19 }
 0x217   : > { %1822 = vmatpush.bf16.msrb.mxu1 %v1811_v32 }
 0x219   : > { %v1763_v51 = vpop.f32.mrf.mxu3 }
 0x21a   : > { %v1764_v8 = vadd.f32 %v4086_v14, %v1763_v51 }
 0x21c   : > { %v1708_v46 = vpop.f32.mrf.mxu0  ;;  %v1801_v43 = vmax.f32 %v1764_v8, 0.0  ;;  %v2782_v8 = vmov 1065369472  }
 0x21d   : > { %v1709_v23 = vadd.f32 %v4086_v14, %v1708_v46 }
 0x21f   : > { %v1779_v35 = vmax.f32 %v1709_v23, 0.0 }
 0x221   : > { %v1765_v2 = vpop.f32.mrf.mxu3 }
 0x222   : > { %v1766_v41 = vadd.f32 %v4086_v14, %v1765_v2 }
 0x224   : > { %v1710_v38 = vpop.f32.mrf.mxu0  ;;  %v1802_v11 = vmax.f32 %v1766_v41, 0.0 }
 0x225   : > { %v4144_v3 = vpop.f32.mrf.mxu1  ;;  %v1711_v1 = vadd.f32 %v4086_v14, %v1710_v38 }
 0x226   : > { %v1819_v62 = vpack.c.bf16 %v1802_v11, %v1801_v43  ;;  %v1734_v38 = vadd.f32 %v4086_v14, %v4144_v3 }
 0x227   : > { %v1780_v59 = vmax.f32 %v1711_v1, 0.0 }
 0x229   : > { %v1808_v31 = vpack.c.bf16 %v1780_v59, %v1779_v35 }
 0x22d   : > { %v1735_v53 = vpop.f32.mrf.mxu1 }
 0x22e   : > { %v1736_v13 = vadd.f32 %v4086_v14, %v1735_v53 }
 0x23a   : > { %v1768_v26 = vpop.f32.mrf.mxu3 }
 0x23b   : > { %v1769_v20 = vadd.f32 %v4086_v14, %v1768_v26 }
 0x23d   : > { %v1713_v37 = vpop.f32.mrf.mxu0  ;;  %v1803_v34 = vmax.f32 %v1769_v20, 0.0 }
 0x23e   : > { %v1714_v44 = vadd.f32 %v4086_v14, %v1713_v37  ;;  %v1789_v37 = vmax.f32 %v1734_v38, 0.0 }
 0x240   : > { %v1781_v48 = vmax.f32 %v1714_v44, 0.0 }
 0x242   : > { %v1770_v63 = vpop.f32.mrf.mxu3 }
 0x243   : > { %v1771_v6 = vadd.f32 %v4086_v14, %v1770_v63  ;;  %v1790_v63 = vmax.f32 %v1736_v13, 0.0 }
 0x245   : > { %v1804_v27 = vmax.f32 %v1771_v6, 0.0  ;;  %v1715_v52 = vpop.f32.mrf.mxu0  ;;  %v1813_v6 = vpack.c.bf16 %v1790_v63, %v1789_v37 }
 0x246   : > { %v1716_v28 = vadd.f32 %v4086_v14, %v1715_v52 }
 0x247   : > { %v1820_v58 = vpack.c.bf16 %v1804_v27, %v1803_v34  ;;  %v1847_v27 = vlaneseq }
 0x248   : > { %v1782_v16 = vmax.f32 %v1716_v28, 0.0 }
 0x249   : > { %1834 = vmatpush.bf16.msra.mxu2 %v1820_v58  ;;  %v1848_v30 = vshrl.u32 %v1847_v27, 7 }
 0x24a   : > { %v1809_v22 = vpack.c.bf16 %v1782_v16, %v1781_v48 }
 0x24c   : > { %v1738_v15 = vpop.f32.mrf.mxu1 }
 0x24d   : > { %1835 = vmatpush.bf16.msra.mxu2 %v1819_v62  ;;  %v1739_v51 = vadd.f32 %v4086_v14, %v1738_v15 }
 0x24f   : > { %v1791_v20 = vmax.f32 %v1739_v51, 0.0 }
 0x251   : > { %1836 = vmatpush.bf16.msra.mxu2 %v1818_v9 }
 0x254   : > { %v1740_v55 = vpop.f32.mrf.mxu1 }
 0x255   : > { %v1718_v61 = vpop.f32.mrf.mxu0  ;;  %1837 = vmatpush.bf16.msra.mxu2 %v1817_v39  ;;  %v1741_v32 = vadd.f32 %v4086_v14, %v1740_v55 }
 0x256   : > { %v1719_v7 = vadd.f32 %v4086_v14, %v1718_v61 }
 0x257   : > { %v1792_v2 = vmax.f32 %v1741_v32, 0.0 }
 0x258   : > { %v1783_v57 = vmax.f32 %v1719_v7, 0.0 }
 0x259   : > { %1838 = vmatpush.bf16.msra.mxu2 %v4101_v10  ;;  %v1814_v41 = vpack.c.bf16 %v1792_v2, %v1791_v20 }
 0x25d   : > { %v1720_v18 = vpop.f32.mrf.mxu0 }
 0x25e   : > { %v1721_v54 = vadd.f32 %v4086_v14, %v1720_v18 }
 0x260   : > { %v1784_v21 = vmax.f32 %v1721_v54, 0.0 }
 0x262   : > { %v1810_v33 = vpack.c.bf16 %v1784_v21, %v1783_v57 }
 0x264   : > { %v1743_v10 = vpop.f32.mrf.mxu1  ;;  %1823 = vmatpush.bf16.msrb.mxu1 %v1810_v33 }
 0x265   : > { %v1744_v42 = vadd.f32 %v4086_v14, %v1743_v10 }
 0x267   : > { %v1793_v25 = vmax.f32 %v1744_v42, 0.0 }
 0x268   : > { %1824 = vmatpush.bf16.msrb.mxu1 %v1809_v22 }
 0x26c   : > { %v1745_v40 = vpop.f32.mrf.mxu1  ;;  %1825 = vmatpush.bf16.msrb.mxu1 %v1808_v31 }
 0x26d   : > { %v1746_v24 = vadd.f32 %v4086_v14, %v1745_v40  ;;  %v1850_v14 = vstv %s2831_s25 }
 0x26e   : > { %vm1851_vm12 = vcmp.eq.s32.totalorder %v1848_v30, %v1850_v14 }
 0x26f   : > { %v1794_v46 = vmax.f32 %v1746_v24, 0.0 }
 0x270   : > { %1826 = vmatpush.bf16.msrb.mxu1 %v1807_v4 }
 0x271   : > { %v1815_v26 = vpack.c.bf16 %v1794_v46, %v1793_v25 }
 0x273   : > { %1839 = vmatpush.bf16.msra.mxu2 %v1815_v26 }
 0x274   : > { %1827 = vmatpush.bf16.msrb.mxu1 %v4133_v47  ;;  %v1849_v47 = vld [vmem:[#allocation2] sm:$0xf] }
 0x277   : > { %1840 = vmatpush.bf16.msra.mxu2 %v1814_v41 }
 0x278   : > { %1828 = vmatpush.bf16.msrb.mxu1 %v4105_v5 }
 0x27b   : > { %1841 = vmatpush.bf16.msra.mxu2 %v1813_v6  ;;  %1829 = vmatmul.bf16.vlgmr.msrb.gmra.mxu1 %v2782_v8 }
 0x27e   : > { %1842 = vmatmul.bf16.vlgmr.msra.gmra.mxu2 %v2782_v8 }
 0x2f8   : > { %v1830_v34 = vpop.f32.mrf.mxu1 }
 0x300   : > { %v1832_v3 = vpop.f32.mrf.mxu1 }
 0x301   : > { %v1843_v11 = vpop.f32.mrf.mxu2 }
 0x302   : > { %v1844_v58 = vadd.f32 %v1843_v11, %v1830_v34 }
 0x304   : > { %v1852_v0 = vperm.slane %v1844_v58, 0 }
 0x305   : > { %1859 = sbr.rel (%p2029_p5) target bundleno = 997 (0x3e5), region = 56 }
 0x306   : > { %v1853_v43 = vsel %vm1851_vm12, %v1852_v0, 0.0 }
 0x307   : > { %v1854_v53 = vadd.f32 %v1853_v43, %v1849_v47 }
 0x309   : > { %1855 = vst [vmem:[#allocation2] sm:$0xf] %v1854_v53  ;;  %v1845_v45 = vpop.f32.mrf.mxu2 }
 0x30a   : > { %v1877_v5 = vld [vmem:[%s4243_s3 + $0x78] sm:$0xff]  ;;  %v1876_v29 = vld [vmem:[%s4243_s3 + $0x70] sm:$0xff]  ;;  %v1875_v62 = vld [vmem:[%s4243_s3 + $0x68] sm:$0xff]  ;;  %v2783_v57 = vmov 4.0   ;;  %vm1902_vm13 = vcmask 1043456  }
 0x30b   : > { %1882 = vmatpush.msra.mxu0 %v1877_v5  ;;  %v1874_v49 = vld [vmem:[%s4243_s3 + $0x60] sm:$0xff]  ;;  %v1873_v56 = vld [vmem:[%s4243_s3 + $0x58] sm:$0xff]  ;;  %v1872_v52 = vld [vmem:[%s4243_s3 + $0x50] sm:$0xff]  ;;  %2728 = vrcp.f32 %v2783_v57 }
 0x30c   : > { %v1871_v60 = vld [vmem:[%s4243_s3 + $0x48] sm:$0xff]  ;;  %v1870_v9 = vld [vmem:[%s4243_s3 + $0x40] sm:$0xff]  ;;  %v1869_v50 = vld [vmem:[%s4243_s3 + $0x38] sm:$0xff] }
 0x30d   : > { %1883 = vmatpush.msra.mxu0 %v1876_v29  ;;  %v1868_v15 = vld [vmem:[%s4243_s3 + $0x30] sm:$0xff]  ;;  %v1867_v39 = vld [vmem:[%s4243_s3 + $0x28] sm:$0xff]  ;;  %v1866_v61 = vld [vmem:[%s4243_s3 + $0x20] sm:$0xff] }
 0x30e   : > { %v1865_v55 = vld [vmem:[%s4243_s3 + $0x18] sm:$0xff]  ;;  %v1864_v7 = vld [vmem:[%s4243_s3 + $0x10] sm:$0xff]  ;;  %v1863_v28 = vld [vmem:[%s4243_s3 + $0x8] sm:$0xff] }
 0x30f   : > { %1884 = vmatpush.msra.mxu0 %v1875_v62  ;;  %v1862_v54 = vld [vmem:[%s4243_s3] sm:$0xff] }
 0x310   : > { %v1860_v18 = vld [vmem:[#allocation2] sm:$0xf] }
 0x311   : > { %1885 = vmatpush.msra.mxu0 %v1874_v49  ;;  %v1861_v44 = vmul.f32 0.00390625, %v1860_v18  ;;  %v2729_v21 = vpop.eup %2728  ;;  %v2725_v1 = vld [vmem:[%s4244_s4] ss:$0 sm:$0xff] }
 0x312   : > { %v1911_v16 = vmul.f32 4.0, %v2729_v21  ;;  %vm1915_vm14 = vweird.f32 %v2729_v21  ;;  %v2726_v8 = vld [vmem:[%s4245_s5] ss:$0 sm:$0xff] }
 0x313   : > { %1886 = vmatpush.msra.mxu0 %v1873_v56  ;;  %v2727_v14 = vld [vmem:[%s4246_s6] ss:$0 sm:$0xff] }
 0x314   : > { %v1912_v48 = vsub.f32 1.0, %v1911_v16 }
 0x315   : > { %1887 = vmatpush.msra.mxu0 %v1872_v52 }
 0x316   : > { %v1913_v59 = vmul.f32 %v2729_v21, %v1912_v48 }
 0x317   : > { %1888 = vmatpush.msra.mxu0 %v1871_v60 }
 0x318   : > { %v1914_v35 = vadd.f32 %v2729_v21, %v1913_v59 }
 0x319   : > { %1889 = vmatpush.msra.mxu0 %v1870_v9 }
 0x31a   : > { %v1916_v42 = vsel %vm1915_vm14, %v2729_v21, %v1914_v35 }
 0x31b   : > { %1890 = vmatpush.msra.mxu0 %v1869_v50 }
 0x31d   : > { %1891 = vmatpush.msra.mxu0 %v1868_v15 }
 0x31f   : > { %1892 = vmatpush.msra.mxu0 %v1867_v39 }
 0x321   : > { %1893 = vmatpush.msra.mxu0 %v1866_v61 }
 0x323   : > { %1894 = vmatpush.msra.mxu0 %v1865_v55 }
 0x325   : > { %1895 = vmatpush.msra.mxu0 %v1864_v7 }
 0x327   : > { %1896 = vmatpush.msra.mxu0 %v1863_v28 }
 0x329   : > { %1897 = vmatpush.msra.mxu0 %v1862_v54 }
 0x32a   : > { %1898 = vmatmul.f32.vlgmr.msra.gmra.mxu0 %v1861_v44 }
 0x3a7   : > { %v1899_v33 = vpop.f32.mrf.mxu0 }
 0x3a8   : > { %v1900_v23 = vadd.f32 %v2725_v1, %v1899_v33 }
 0x3aa   : > { %v1903_v10 = vsel %vm1902_vm13, %v1900_v23, 0.0 }
 0x3ab   : > { %v1904_v36 = vrot.slane %v1903_v10, 4 }
 0x3ad   : > { %v1905_v22 = vadd.f32 %v1904_v36, %v1903_v10 }
 0x3af   : > { %v1906_v12 = vrot.slane %v1905_v22, 2 }
 0x3b1   : > { %v1907_v17 = vadd.f32 %v1906_v12, %v1905_v22 }
 0x3b3   : > { %v1908_v31 = vrot.slane %v1907_v17, 1 }
 0x3b5   : > { %v1909_v19 = vadd.f32 %v1908_v31, %v1907_v17 }
 0x3b7   : > { %v1917_v40 = vmul.f32 %v1916_v42, %v1909_v19 }
 0x3b9   : > { %v1918_v32 = vsub.f32 %v1900_v23, %v1917_v40 }
 0x3bb   : > { %v1919_v24 = vmul.f32 %v1918_v32, %v1918_v32  ;;  %v1943_v30 = vmul.f32 %v2726_v8, %v1918_v32 }
 0x3bd   : > { %v1920_v4 = vsel %vm1902_vm13, %v1919_v24, 0.0 }
 0x3be   : > { %v1921_v51 = vrot.slane %v1920_v4, 4 }
 0x3c0   : > { %v1922_v25 = vadd.f32 %v1921_v51, %v1920_v4 }
 0x3c2   : > { %v1923_v46 = vrot.slane %v1922_v25, 2 }
 0x3c4   : > { %v1924_v13 = vadd.f32 %v1923_v46, %v1922_v25 }
 0x3c6   : > { %v1925_v2 = vrot.slane %v1924_v13, 1 }
 0x3c8   : > { %v1926_v26 = vadd.f32 %v1925_v2, %v1924_v13 }
 0x3ca   : > { %v1927_v38 = vmul.f32 %v1926_v26, %v1916_v42 }
 0x3cc   : > { %v1928_v20 = vadd.f32 1e-05, %v1927_v38 }
 0x3ce   : > { %2730 = vrsqrt.f32 %v1928_v20  ;;  %vm1935_vm0 = vweird.f32 %v1928_v20 }
 0x3d4   : > { %v2731_v63 = vpop.eup %2730 }
 0x3d5   : > { %v1930_v41 = vmul.f32 %v2731_v63, %v1928_v20  ;;  %vm1936_vm15 = vweird.f32 %v2731_v63 }
 0x3d6   : > { %vm1937_vm1 = vmor %vm1935_vm0, %vm1936_vm15 }
 0x3d7   : > { %v1931_v37 = vmul.f32 %v2731_v63, %v1930_v41 }
 0x3d9   : > { %v1932_v6 = vmul.f32 0.5, %v1931_v37 }
 0x3db   : > { %v1933_v34 = vsub.f32 1.5, %v1932_v6 }
 0x3dd   : > { %v1934_v27 = vmul.f32 %v2731_v63, %v1933_v34 }
 0x3df   : > { %v1938_v3 = vsel %vm1937_vm1, %v2731_v63, %v1934_v27 }
 0x3e0   : > { %v1944_v11 = vmul.f32 %v1943_v30, %v1938_v3 }
 0x3e2   : > { %v1949_v58 = vadd.f32 %v2727_v14, %v1944_v11 }
 0x3e4   : > { %1950 = vst [vmem:[#allocation3] sm:$0xf] %v1949_v58 }
 0x3e5 PF: > { %p2045_p6 = scmp.eq.s32.totalorder %s2831_s25, 3  ;;  %s2784_s20 = smov [#allocation3]  }
 0x3e6   : > { %s1957_s21 = sshll.u32 %s2784_s20, 4  ;;  %s1959_s26 = sshll.u32 %s4247_s7, 4  ;;  %s1958_s21 = int_to_ptr.vmem [resolvable:$true] %s1957_s21  ;;  %s1960_s26 = int_to_ptr.hbm [resolvable:$true] %s1959_s26 }
 0x3e7   : > { %2042 = dma.vmem_to_hbm [thread:$0]  (%p2045_p6), %s1958_s21, 64, %s1960_s26, [#allocation4]  }
 0x3e8   : > { %2765 = dma.done.wait (%p2045_p6), [#allocation4], 64  }
 0x3e9   : > { %2767 = vsyncadd (%p2045_p6), [#allocation4], 4294967232 }
 0x3ea PF: > { %s18_s24 = sadd.s32 1, %s2770_s24  }
 0x3eb   : > { %p15_p7 = scmp.ge.s32.totalorder %s18_s24, 6  }
 0x3ed   :  { %17 = sbr.rel (!%p15_p7) target bundleno = 1 (0x1), region = 83 }
 0x3f2   :  { %1973 = vsyncpa [#allocation4], 1 }
 0x3f3   :  { %1975 = vsyncpa [#allocation4 + $0x1], 1 }

</bundles_post_ra>
